<compile_context>
chip_gen: v5e
topology: v5e:2x2
jax: 0.10.0
libtpu: 0.0.40
codegen_flags: <defaults>
</compile_context>

<pallas_src>
import functools

import jax
import jax.numpy as jnp
from jax import lax
from jax.experimental import pallas as pl
from jax.experimental.pallas import tpu as pltpu

_NEG_BIG = -1e30  # "minus infinity" that stays NaN-free through max/exp.


# -----------------------------------------------------------------------------
# Small helpers.
# -----------------------------------------------------------------------------
def _round_up(x, m):
    return (x + m - 1) // m * m


def _pad_dim0(x, n):
    pad = n - x.shape[0]
    if pad == 0:
        return x
    return jnp.concatenate(
        [x, jnp.zeros((pad,) + x.shape[1:], dtype=x.dtype)], axis=0)


@functools.lru_cache(maxsize=None)
def _chip_config():
    """Generation-aware tiling config (VMEM capacity, tile caps, budgets)."""
    kind = ""
    try:
        kind = jax.devices()[0].device_kind.lower()
    except Exception:
        pass
    cap = None
    try:
        cap = int(pltpu.get_tpu_info().vmem_capacity_bytes)
    except Exception:
        cap = None
    if not cap or cap <= 0:
        cap = 64 * 2**20 if "v7" in kind else 128 * 2**20
    if "v7" in kind:
        gen = "v7x"
    elif "v6" in kind:
        gen = "v6e"
    elif "v5" in kind:
        gen = "v5e"
    else:
        gen = "v6e" if cap >= 100 * 2**20 else "v7x"
    # Row tile ~= FLOP per byte of streamed LM-head weight.  Roofline knees:
    # v5e ~240 FLOP/B, v6e ~650 FLOP/B, v7x ~311 FLOP/B (per TC).
    row_cap = {"v5e": 256, "v6e": 1024, "v7x": 512}[gen]
    vocab_cap = {"v5e": 512, "v6e": 1024, "v7x": 1024}[gen]
    budget = int(cap * 0.70)          # working-set budget for the tiles
    limit_cap = cap - (12 << 20)      # headroom for Mosaic internal scratch
    return {"gen": gen, "vmem_cap": cap, "row_cap": row_cap,
            "vocab_cap": vocab_cap, "budget": budget, "limit_cap": limit_cap}


def _pick_tiles(n_rows, hidden, v_cols, row_bytes, w_bytes, cfg, *,
                row_tile=None, vocab_tile=None, hidden_tile=None,
                allow_h_split=True):
    """Pick (row_tile, vocab_tile, hidden_tile, vmem_limit) under the
    generation-aware VMEM budget.  Shrink order keeps the row tile (the
    arithmetic-intensity lever) as long as possible: vocab tile -> hidden
    split -> vocab floor -> row tile."""
    row_cap = cfg["row_cap"]
    vocab_cap = cfg["vocab_cap"]
    budget = cfg["budget"]
    limit_cap = cfg["limit_cap"]

    if row_tile is None:
        tr = row_cap if n_rows >= row_cap else _round_up(max(n_rows, 8), 8)
    else:
        tr = _round_up(max(row_tile, 8), 8)

    v_full = _round_up(max(v_cols, 128), 128)
    if vocab_tile is None:
        tn = min(vocab_cap, v_full)
    else:
        tn = min(_round_up(max(vocab_tile, 128), 128), v_full)

    if hidden_tile is not None and allow_h_split:
        th = min(_round_up(max(hidden_tile, 128), 128), hidden)
        if hidden % th != 0:          # require an even split of the K axis
            th = hidden
    else:
        th = hidden

    def est(tr_, tn_, th_):
        extra_acc = 0 if th_ == hidden else tr_ * tn_ * 4   # H-split f32 acc
        return (2 * tr_ * th_ * row_bytes    # hidden tile, double-buffered
                + 2 * tn_ * th_ * w_bytes    # weight tile, double-buffered
                + 4 * tr_ * tn_ * 4          # f32 (tr, tn) intermediates
                + extra_acc
                + 8 * tr_ * 4)               # ids / small scratch / outputs

    def half_h(th_):
        c = th_ // 2
        if allow_h_split and c >= 512 and c % 128 == 0 and hidden % c == 0:
            return c
        return None

    while est(tr, tn, th) > budget:
        if tn > 512:
            tn = max(512, (tn // 2) // 128 * 128)
        elif half_h(th) is not None:
            th = half_h(th)
        elif tn > 128:
            tn = max(128, (tn // 2) // 128 * 128)
        elif tr > 8:
            tr = max(8, (tr // 2) // 8 * 8)
        else:
            break

    vmem_limit = int(min(limit_cap,
                         max(32 * 2**20, est(tr, tn, th) + (16 << 20))))
    return tr, tn, th, vmem_limit


# -----------------------------------------------------------------------------
# Kernel 1: online-softmax over vocab tiles + next-token logprob gather.
# grid = (token_tiles [parallel], vocab_tiles [arbitrary][, hidden_tiles]).
# -----------------------------------------------------------------------------
def _token_logprob_kernel(vocab_cols, need_mask, n_h, ids_ref, h_ref, w_ref,
                          tok_lp_ref, m_sc, s_sc, g_sc, *acc_scratch):
    split_h = n_h > 1
    vi = pl.program_id(1)
    tn = w_ref.shape[0]
    n_v = pl.num_programs(1)

    if split_h:
        hi = pl.program_id(2)
        first_step = (vi == 0) & (hi == 0)
    else:
        hi = None
        first_step = vi == 0

    @pl.when(first_step)
    def _init():
        m_sc[...] = jnp.full_like(m_sc, _NEG_BIG)
        s_sc[...] = jnp.zeros_like(s_sc)
        g_sc[...] = jnp.zeros_like(g_sc)

    def _softmax_update(logits):
        # Global vocab column index for this tile.  The iota is needed for the
        # next-token one-hot gather regardless; the padded-column mask is only
        # emitted when the last vocab tile is ragged (need_mask is static).
        # Note: with grid = cdiv(vocab_cols, tn) the first vocab tile always
        # contains at least one unmasked column, so the -1e30 sentinel in m_sc
        # is always replaced before it can corrupt the denominator.
        col = lax.broadcasted_iota(jnp.int32, logits.shape, 1) + vi * tn
        if need_mask:
            logits = jnp.where(col < vocab_cols, logits, _NEG_BIG)

        m_prev = m_sc[...]
        m_new = jnp.maximum(m_prev, jnp.max(logits, axis=-1, keepdims=True))
        alpha = jnp.exp(m_prev - m_new)
        e = jnp.exp(logits - m_new)                            # (tm, tn)

        ids = ids_ref[...]                                     # (tm, 1) int32
        hit = col == ids
        g_sc[...] = g_sc[...] * alpha + jnp.sum(
            jnp.where(hit, e, 0.0), axis=-1, keepdims=True)
        s_sc[...] = s_sc[...] * alpha + jnp.sum(e, axis=-1, keepdims=True)
        m_sc[...] = m_new

        @pl.when(vi == n_v - 1)
        def _finalize():
            # Exact division (runs once per token tile; not on the hot path).
            tok_lp_ref[...] = jnp.log(g_sc[...] / s_sc[...] + 1e-6)

    # bf16 on the MXU, f32 accumulation; contract H directly (no transpose).
    # TODO(synk): pipeline_mode=pl.Buffered(1) on the hidden tile (its block
    # index is constant along the inner vocab axis) would free one buffer of
    # VMEM for an even larger row tile.
    h = h_ref[...].astype(jnp.bfloat16)                        # (tm, th)
    w = w_ref[...].astype(jnp.bfloat16)                        # (tn, th)
    part = lax.dot_general(h, w, (((1,), (1,)), ((), ())),
                           preferred_element_type=jnp.float32)  # (tm, tn)

    if split_h:
        acc_sc = acc_scratch[0]

        @pl.when(hi == 0)
        def _zero_acc():
            acc_sc[...] = jnp.zeros_like(acc_sc)

        acc_sc[...] += part

        @pl.when(hi == n_h - 1)
        def _update():
            _softmax_update(acc_sc[...])
    else:
        _softmax_update(part)


def token_next_logprobs(hidden_states, weight, next_ids, vocab_size, *,
                        row_tile=None, vocab_tile=None, hidden_tile=None):
    """log(softmax((h @ W.T)[:, :vocab_size]) + 1e-6) gathered at next_ids.

    Returns a (T,) float32 vector; the [T, V] logits are never materialized.
    The LM-head weight is streamed un-padded (ragged last vocab tile is
    masked in-kernel) -- callers should pass a bf16 weight to avoid any cast.
    """
    if jnp.dtype(hidden_states.dtype).itemsize > 2:
        hidden_states = hidden_states.astype(jnp.bfloat16)
    if jnp.dtype(weight.dtype).itemsize > 2:
        # TODO(synk): cache a bf16 LM-head weight outside the forward instead
        # of paying this O(V*H) cast per call (no-op when weight is bf16).
        weight = weight.astype(jnp.bfloat16)

    T, H = hidden_states.shape
    V, Hw = weight.shape
    assert H == Hw
    # Reference slices logits[:, :vocab_size] of a V-column matmul, so the
    # effective softmax width is min(V, vocab_size).
    v_cols = min(vocab_size, V)

    cfg = _chip_config()
    tm, tn, th, vmem_limit = _pick_tiles(
        T, H, v_cols,
        jnp.dtype(hidden_states.dtype).itemsize,
        jnp.dtype(weight.dtype).itemsize,
        cfg, row_tile=row_tile, vocab_tile=vocab_tile, hidden_tile=hidden_tile)

    # On v7x keep >= 2 token tiles so the "parallel" axis splits across the
    # two TensorCores (only worth duplicating the weight stream for large T).
    if row_tile is None and cfg["gen"] == "v7x" and T > 256:
        if pl.cdiv(T, tm) < 2:
            tm = _round_up(pl.cdiv(T, 2), 8)

    n_tok = pl.cdiv(T, tm)
    n_v = pl.cdiv(v_cols, tn)          # vocab grid clipped to the real vocab
    n_h = H // th                      # th == H or th | H by construction
    need_mask = (n_v * tn) != v_cols   # only the ragged last tile needs it

    # Token rows are cheap to pad (<= one row tile of hidden); the weight is
    # never padded or copied.
    T_pad = n_tok * tm
    h_pad = _pad_dim0(hidden_states, T_pad)
    ids_pad = _pad_dim0(next_ids.astype(jnp.int32).reshape(T, 1), T_pad)

    kernel = functools.partial(_token_logprob_kernel, v_cols, need_mask, n_h)

    scratch = [pltpu.VMEM((tm, 1), jnp.float32),   # running max
               pltpu.VMEM((tm, 1), jnp.float32),   # denominator
               pltpu.VMEM((tm, 1), jnp.float32)]   # gathered exp
    if n_h > 1:
        scratch.append(pltpu.VMEM((tm, tn), jnp.float32))   # K-split acc

    if n_h > 1:
        grid = (n_tok, n_v, n_h)
        in_specs = [
            pl.BlockSpec((tm, 1), lambda ti, vi, hi: (ti, 0)),    # next ids
            pl.BlockSpec((tm, th), lambda ti, vi, hi: (ti, hi)),  # hidden
            pl.BlockSpec((tn, th), lambda ti, vi, hi: (vi, hi)),  # weight
        ]
        out_specs = pl.BlockSpec((tm, 1), lambda ti, vi, hi: (ti, 0))
        dims = ("parallel", "arbitrary", "arbitrary")
    else:
        grid = (n_tok, n_v)
        in_specs = [
            pl.BlockSpec((tm, 1), lambda ti, vi: (ti, 0)),        # next ids
            pl.BlockSpec((tm, H), lambda ti, vi: (ti, 0)),        # hidden
            pl.BlockSpec((tn, H), lambda ti, vi: (vi, 0)),        # weight
        ]
        out_specs = pl.BlockSpec((tm, 1), lambda ti, vi: (ti, 0))
        dims = ("parallel", "arbitrary")

    tok_lp = pl.pallas_call(
        kernel,
        out_shape=jax.ShapeDtypeStruct((T_pad, 1), jnp.float32),
        grid_spec=pltpu.PrefetchScalarGridSpec(
            num_scalar_prefetch=0,
            grid=grid,
            in_specs=in_specs,
            out_specs=out_specs,
            scratch_shapes=scratch,
        ),
        compiler_params=pltpu.CompilerParams(
            dimension_semantics=dims,
            vmem_limit_bytes=vmem_limit),
    )(ids_pad, h_pad, weight)
    return tok_lp[:T, 0]


# -----------------------------------------------------------------------------
# Kernel 2: logits for selected rows only (last-token rows / decode rows).
# -----------------------------------------------------------------------------
def _rows_logits_kernel(h_ref, w_ref, out_ref):
    h = h_ref[...].astype(jnp.bfloat16)                        # (tr, H)
    w = w_ref[...].astype(jnp.bfloat16)                        # (tn, H)
    out_ref[...] = lax.dot_general(h, w, (((1,), (1,)), ((), ())),
                                   preferred_element_type=jnp.float32)


def rows_logits(rows, weight, vocab_size, *, row_tile=None, vocab_tile=None):
    """(rows @ weight.T)[:, :min(V, vocab_size)] in f32, rows/vocab tiled.

    The weight is streamed un-padded; only the output columns are rounded up
    to the vocab tile (output allocation only, no input copy).
    """
    # TODO(synk): an int8 (v5e/v6e) or fp8 (v7x) LM-head weight would halve
    # the HBM traffic of this purely memory-bound path.
    if jnp.dtype(rows.dtype).itemsize > 2:
        rows = rows.astype(jnp.bfloat16)
    if jnp.dtype(weight.dtype).itemsize > 2:
        weight = weight.astype(jnp.bfloat16)

    R, H = rows.shape
    V, Hw = weight.shape
    assert H == Hw
    v_cols = min(vocab_size, V)

    cfg = _chip_config()
    tr, tn, _, vmem_limit = _pick_tiles(
        R, H, v_cols,
        jnp.dtype(rows.dtype).itemsize, jnp.dtype(weight.dtype).itemsize,
        cfg, row_tile=row_tile, vocab_tile=vocab_tile, allow_h_split=False)

    n_r = pl.cdiv(R, tr)
    n_v = pl.cdiv(v_cols, tn)
    R_pad = n_r * tr
    V_out = n_v * tn                  # padded output columns (output only)
    rows_p = _pad_dim0(rows, R_pad)

    out = pl.pallas_call(
        _rows_logits_kernel,
        out_shape=jax.ShapeDtypeStruct((R_pad, V_out), jnp.float32),
        grid_spec=pltpu.PrefetchScalarGridSpec(
            num_scalar_prefetch=0,
            grid=(n_r, n_v),
            in_specs=[
                pl.BlockSpec((tr, H), lambda ri, vi: (ri, 0)),
                pl.BlockSpec((tn, H), lambda ri, vi: (vi, 0)),
            ],
            out_specs=pl.BlockSpec((tr, tn), lambda ri, vi: (ri, vi)),
        ),
        compiler_params=pltpu.CompilerParams(
            dimension_semantics=("parallel", "parallel"),
            vmem_limit_bytes=vmem_limit),
    )(rows_p, weight)
    return out[:R, :v_cols]


# -----------------------------------------------------------------------------
# Glue: exact semantics of compute_normalized_logprobs (cheap scalar work).
# -----------------------------------------------------------------------------
def _compute_normalized_logprobs(token_logprobs, seq_lens, start_loc):
    logprobs = token_logprobs.reshape(-1)                          # (T,)
    logprobs_cumsum = jnp.cumsum(logprobs, dtype=jnp.float32)
    T = logprobs.shape[0]
    start = jnp.clip(start_loc, 0, T - 1)
    end = jnp.clip(start_loc + seq_lens - 2, 0, T - 1)
    sum_logp = logprobs_cumsum[end] - logprobs_cumsum[start] + logprobs[start]
    return sum_logp / jnp.maximum(seq_lens - 1, 1).astype(jnp.float32)


# -----------------------------------------------------------------------------
# LogitsProcessor.forward equivalent (tp_size == 1).
# -----------------------------------------------------------------------------
def logits_processor_forward(input_ids, hidden_states, weight, *,
                             vocab_size, seq_lens, prefix_lens,
                             extend_seq_lens, extend_start_loc,
                             return_normalized_logprob, forward_mode_decode):
    # TODO(synk): tensor_model_parallel_all_gather is a multi-chip collective;
    # with tp_size == 1 it is a no-op and is omitted here.
    if not return_normalized_logprob:
        if forward_mode_decode:
            last_hidden = hidden_states
        else:
            last_index = jnp.cumsum(seq_lens - prefix_lens) - 1
            last_hidden = hidden_states[last_index]
        last_logits = rows_logits(last_hidden, weight, vocab_size)
        return last_logits, None
    else:
        assert not forward_mode_decode
        T = hidden_states.shape[0]
        next_ids = jnp.concatenate(
            [input_ids[1:], jnp.zeros((1,), dtype=input_ids.dtype)])
        # Per-token next-token logprobs WITHOUT materializing [T, V] logits.
        tok_lp = token_next_logprobs(hidden_states, weight, next_ids,
                                     vocab_size)
        normalized_logprobs = _compute_normalized_logprobs(
            tok_lp, extend_seq_lens, extend_start_loc)
        # last_logits = logits[last_index] == (hidden[last_index] @ W.T)[:, :V]
        last_index = jnp.cumsum(seq_lens - prefix_lens) - 1
        last_logits = rows_logits(hidden_states[last_index], weight,
                                  vocab_size)
        return last_logits, normalized_logprobs


# -----------------------------------------------------------------------------
# Demo + correctness check against a pure-JAX reference.
# -----------------------------------------------------------------------------
if __name__ == "__main__":
    key = jax.random.PRNGKey(0)
    k_h, k_w, k_ids = jax.random.split(key, 3)

    H = 256                   # hidden size (allows exercising the H-split)
    V = 1024                  # LM-head rows
    VOCAB = 1000              # config.vocab_size < V: exercises column masking
    seq_lens = jnp.array([7, 12], dtype=jnp.int32)
    prefix_lens = jnp.array([0, 0], dtype=jnp.int32)
    extend_seq_lens = seq_lens
    extend_start_loc = jnp.array([0, 7], dtype=jnp.int32)
    T = int(seq_lens.sum())   # 19 packed tokens (exercises row padding)

    hidden_states = jax.random.normal(
        k_h, (T, H), dtype=jnp.float32).astype(jnp.bfloat16)
    weight = (jax.random.normal(k_w, (V, H), dtype=jnp.float32)
              * 0.05).astype(jnp.bfloat16)
    input_ids = jax.random.randint(k_ids, (T,), 0, VOCAB, dtype=jnp.int32)

    # --- normalized-logprob (extend/prefill) path ----------------------------
    last_logits, normalized_logprobs = logits_processor_forward(
        input_ids, hidden_states, weight,
        vocab_size=VOCAB, seq_lens=seq_lens, prefix_lens=prefix_lens,
        extend_seq_lens=extend_seq_lens, extend_start_loc=extend_start_loc,
        return_normalized_logprob=True, forward_mode_decode=False)
    jax.block_until_ready((last_logits, normalized_logprobs))

    # --- non-normalized prefill path -----------------------------------------
    last_only, none_out = logits_processor_forward(
        input_ids, hidden_states, weight,
        vocab_size=VOCAB, seq_lens=seq_lens, prefix_lens=prefix_lens,
        extend_seq_lens=extend_seq_lens, extend_start_loc=extend_start_loc,
        return_normalized_logprob=False, forward_mode_decode=False)
    jax.block_until_ready(last_only)
    assert none_out is None

    # --- decode path (logits for every row) ----------------------------------
    decode_logits, decode_none = logits_processor_forward(
        input_ids, hidden_states, weight,
        vocab_size=VOCAB, seq_lens=seq_lens, prefix_lens=prefix_lens,
        extend_seq_lens=extend_seq_lens, extend_start_loc=extend_start_loc,
        return_normalized_logprob=False, forward_mode_decode=True)
    jax.block_until_ready(decode_logits)
    assert decode_none is None

    # --- pure-JAX reference ---------------------------------------------------
    h32 = hidden_states.astype(jnp.float32)
    w32 = weight.astype(jnp.float32)
    full_logits = (h32 @ w32.T)[:, :VOCAB]
    all_lp = jnp.log(jax.nn.softmax(full_logits, axis=-1) + 1e-6)
    next_ids = jnp.concatenate(
        [input_ids[1:], jnp.zeros((1,), dtype=input_ids.dtype)])
    ref_tok_lp = all_lp[jnp.arange(T), next_ids]
    ref_norm = _compute_normalized_logprobs(ref_tok_lp, extend_seq_lens,
                                            extend_start_loc)
    last_index = jnp.cumsum(seq_lens - prefix_lens) - 1
    ref_last = full_logits[last_index]

    assert jnp.allclose(last_logits, ref_last, atol=1e-2, rtol=1e-2)
    assert jnp.allclose(last_only, ref_last, atol=1e-2, rtol=1e-2)
    assert jnp.allclose(decode_logits, full_logits, atol=1e-2, rtol=1e-2)
    assert jnp.allclose(normalized_logprobs, ref_norm, atol=1e-2, rtol=1e-2)

    # Coverage: multi-token-tile / multi-vocab-tile grid with ragged last tile.
    tok_lp_small = token_next_logprobs(hidden_states, weight, next_ids, VOCAB,
                                       row_tile=8, vocab_tile=128)
    jax.block_until_ready(tok_lp_small)
    assert jnp.allclose(tok_lp_small, ref_tok_lp, atol=1e-2, rtol=1e-2)

    # Coverage: hidden(K)-reduction grid axis (H split into 2 tiles of 128).
    tok_lp_hsplit = token_next_logprobs(hidden_states, weight, next_ids, VOCAB,
                                        row_tile=16, vocab_tile=256,
                                        hidden_tile=128)
    jax.block_until_ready(tok_lp_hsplit)
    assert jnp.allclose(tok_lp_hsplit, ref_tok_lp, atol=1e-2, rtol=1e-2)

    print("KERNEL_OK")
</pallas_src>

<mosaic_0001>
module attributes {stable_mosaic.version = 11 : i64} {
  func.func @_token_logprob_kernel(%arg0: i32, %arg1: i32, %arg2: memref<24x1xi32, #tpu.memory_space<vmem>>, %arg3: memref<24x256xbf16, #tpu.memory_space<vmem>>, %arg4: memref<1024x256xbf16, #tpu.memory_space<vmem>>, %arg5: memref<24x1xf32, #tpu.memory_space<vmem>>, %arg6: memref<24x1xf32, #tpu.memory_space<vmem>>, %arg7: memref<24x1xf32, #tpu.memory_space<vmem>>, %arg8: memref<24x1xf32, #tpu.memory_space<vmem>>) attributes {dimension_semantics = [#tpu.dimension_semantics<parallel>, #tpu.dimension_semantics<arbitrary>], iteration_bounds = array<i64: 1, 1>, scalar_prefetch = 0 : i64, scratch_operands = 3 : i64, tpu.core_type = #tpu.core_type<tc>, window_params = [{transform_indices = @transform_0, window_bounds = array<i64: 24, 1>}, {transform_indices = @transform_1, window_bounds = array<i64: 24, 256>}, {transform_indices = @transform_2, window_bounds = array<i64: 1024, 256>}, {transform_indices = @transform_3, window_bounds = array<i64: 24, 1>}]} {
    %c0_i32 = arith.constant 0 : i32
    %0 = arith.cmpi eq, %arg1, %c0_i32 : i32
    %1 = arith.extui %0 : i1 to i32
    %c0_i32_0 = arith.constant 0 : i32
    %2 = arith.cmpi ne, %1, %c0_i32_0 : i32
    scf.if %2 {
      %cst_25 = arith.constant -1.000000e+30 : f32
      %44 = vector.broadcast %cst_25 : f32 to vector<24x1xf32>
      %c0_26 = arith.constant 0 : index
      %c0_27 = arith.constant 0 : index
      %45 = vector.load %arg6[%c0_26, %c0_27] : memref<24x1xf32, #tpu.memory_space<vmem>>, vector<24x1xf32>
      tpu.vector_store %arg6[%c0_26, %c0_27], %44 {strides = array<i32>} : memref<24x1xf32, #tpu.memory_space<vmem>>, vector<24x1xf32>,
      %cst_28 = arith.constant 0.000000e+00 : f32
      %46 = vector.broadcast %cst_28 : f32 to vector<24x1xf32>
      %c0_29 = arith.constant 0 : index
      %c0_30 = arith.constant 0 : index
      %47 = vector.load %arg7[%c0_29, %c0_30] : memref<24x1xf32, #tpu.memory_space<vmem>>, vector<24x1xf32>
      tpu.vector_store %arg7[%c0_29, %c0_30], %46 {strides = array<i32>} : memref<24x1xf32, #tpu.memory_space<vmem>>, vector<24x1xf32>,
      %cst_31 = arith.constant 0.000000e+00 : f32
      %48 = vector.broadcast %cst_31 : f32 to vector<24x1xf32>
      %c0_32 = arith.constant 0 : index
      %c0_33 = arith.constant 0 : index
      %49 = vector.load %arg8[%c0_32, %c0_33] : memref<24x1xf32, #tpu.memory_space<vmem>>, vector<24x1xf32>
      tpu.vector_store %arg8[%c0_32, %c0_33], %48 {strides = array<i32>} : memref<24x1xf32, #tpu.memory_space<vmem>>, vector<24x1xf32>,
    } else {
    }
    %c0 = arith.constant 0 : index
    %c0_1 = arith.constant 0 : index
    %3 = vector.load %arg3[%c0, %c0_1] : memref<24x256xbf16, #tpu.memory_space<vmem>>, vector<24x256xbf16>
    %c0_2 = arith.constant 0 : index
    %c0_3 = arith.constant 0 : index
    %4 = vector.load %arg4[%c0_2, %c0_3] : memref<1024x256xbf16, #tpu.memory_space<vmem>>, vector<1024x256xbf16>
    %cst = arith.constant dense<0.000000e+00> : vector<24x1024xf32>
    %5 = tpu.matmul %3, %4, %cst {dimension_numbers = #tpu.dot_dimension_numbers<[1], [1], [0], [0], [0, 0, 1, 0], [], []>} : vector<24x256xbf16>, vector<1024x256xbf16>, vector<24x1024xf32> -> vector<24x1024xf32>
    %6 = tpu.iota {dimensions = array<i32: 1>} : vector<24x1024xi32>
    %c1024_i32 = arith.constant 1024 : i32
    %7 = arith.muli %arg1, %c1024_i32 : i32
    %8 = vector.broadcast %7 : i32 to vector<24x1024xi32>
    %9 = arith.addi %6, %8 : vector<24x1024xi32>
    %c1000_i32 = arith.constant 1000 : i32
    %10 = vector.broadcast %c1000_i32 : i32 to vector<24x1024xi32>
    %11 = arith.cmpi slt, %9, %10 : vector<24x1024xi32>
    %cst_4 = arith.constant -1.000000e+30 : f32
    %12 = vector.broadcast %cst_4 : f32 to vector<24x1024xf32>
    %13 = arith.select %11, %5, %12 : vector<24x1024xi1>, vector<24x1024xf32>
    %c0_5 = arith.constant 0 : index
    %c0_6 = arith.constant 0 : index
    %14 = vector.load %arg6[%c0_5, %c0_6] : memref<24x1xf32, #tpu.memory_space<vmem>>, vector<24x1xf32>
    %cst_7 = arith.constant dense<0xFF800000> : vector<24xf32>
    %15 = vector.multi_reduction <maximumf>, %13, %cst_7 [1] : vector<24x1024xf32> to vector<24xf32>
    %16 = vector.shape_cast %15 : vector<24xf32> to vector<24x1xf32>
    %17 = arith.maximumf %14, %16 : vector<24x1xf32>
    %18 = arith.subf %14, %17 : vector<24x1xf32>
    %19 = math.exp %18 : vector<24x1xf32>
    %20 = vector.broadcast %17 : vector<24x1xf32> to vector<24x1024xf32>
    %21 = arith.subf %13, %20 : vector<24x1024xf32>
    %22 = math.exp %21 : vector<24x1024xf32>
    %c0_8 = arith.constant 0 : index
    %c0_9 = arith.constant 0 : index
    %23 = vector.load %arg2[%c0_8, %c0_9] : memref<24x1xi32, #tpu.memory_space<vmem>>, vector<24x1xi32>
    %24 = vector.broadcast %23 : vector<24x1xi32> to vector<24x1024xi32>
    %25 = arith.cmpi eq, %9, %24 : vector<24x1024xi32>
    %c0_10 = arith.constant 0 : index
    %c0_11 = arith.constant 0 : index
    %26 = vector.load %arg8[%c0_10, %c0_11] : memref<24x1xf32, #tpu.memory_space<vmem>>, vector<24x1xf32>
    %27 = arith.mulf %26, %19 : vector<24x1xf32>
    %cst_12 = arith.constant 0.000000e+00 : f32
    %28 = vector.broadcast %cst_12 : f32 to vector<24x1024xf32>
    %29 = arith.select %25, %22, %28 : vector<24x1024xi1>, vector<24x1024xf32>
    %cst_13 = arith.constant dense<0.000000e+00> : vector<24xf32>
    %30 = vector.multi_reduction <add>, %29, %cst_13 [1] : vector<24x1024xf32> to vector<24xf32>
    %31 = vector.shape_cast %30 : vector<24xf32> to vector<24x1xf32>
    %32 = arith.addf %27, %31 : vector<24x1xf32>
    %c0_14 = arith.constant 0 : index
    %c0_15 = arith.constant 0 : index
    %33 = vector.load %arg8[%c0_14, %c0_15] : memref<24x1xf32, #tpu.memory_space<vmem>>, vector<24x1xf32>
    tpu.vector_store %arg8[%c0_14, %c0_15], %32 {strides = array<i32>} : memref<24x1xf32, #tpu.memory_space<vmem>>, vector<24x1xf32>,
    %c0_16 = arith.constant 0 : index
    %c0_17 = arith.constant 0 : index
    %34 = vector.load %arg7[%c0_16, %c0_17] : memref<24x1xf32, #tpu.memory_space<vmem>>, vector<24x1xf32>
    %35 = arith.mulf %34, %19 : vector<24x1xf32>
    %cst_18 = arith.constant dense<0.000000e+00> : vector<24xf32>
    %36 = vector.multi_reduction <add>, %22, %cst_18 [1] : vector<24x1024xf32> to vector<24xf32>
    %37 = vector.shape_cast %36 : vector<24xf32> to vector<24x1xf32>
    %38 = arith.addf %35, %37 : vector<24x1xf32>
    %c0_19 = arith.constant 0 : index
    %c0_20 = arith.constant 0 : index
    %39 = vector.load %arg7[%c0_19, %c0_20] : memref<24x1xf32, #tpu.memory_space<vmem>>, vector<24x1xf32>
    tpu.vector_store %arg7[%c0_19, %c0_20], %38 {strides = array<i32>} : memref<24x1xf32, #tpu.memory_space<vmem>>, vector<24x1xf32>,
    %c0_21 = arith.constant 0 : index
    %c0_22 = arith.constant 0 : index
    %40 = vector.load %arg6[%c0_21, %c0_22] : memref<24x1xf32, #tpu.memory_space<vmem>>, vector<24x1xf32>
    tpu.vector_store %arg6[%c0_21, %c0_22], %17 {strides = array<i32>} : memref<24x1xf32, #tpu.memory_space<vmem>>, vector<24x1xf32>,
    %c0_i32_23 = arith.constant 0 : i32
    %41 = arith.cmpi eq, %arg1, %c0_i32_23 : i32
    %42 = arith.extui %41 : i1 to i32
    %c0_i32_24 = arith.constant 0 : i32
    %43 = arith.cmpi ne, %42, %c0_i32_24 : i32
    scf.if %43 {
      %c0_25 = arith.constant 0 : index
      %c0_26 = arith.constant 0 : index
      %44 = vector.load %arg8[%c0_25, %c0_26] : memref<24x1xf32, #tpu.memory_space<vmem>>, vector<24x1xf32>
      %c0_27 = arith.constant 0 : index
      %c0_28 = arith.constant 0 : index
      %45 = vector.load %arg7[%c0_27, %c0_28] : memref<24x1xf32, #tpu.memory_space<vmem>>, vector<24x1xf32>
      %46 = arith.divf %44, %45 : vector<24x1xf32>
      %cst_29 = arith.constant 9.99999997E-7 : f32
      %47 = vector.broadcast %cst_29 : f32 to vector<24x1xf32>
      %48 = arith.addf %46, %47 : vector<24x1xf32>
      %49 = math.log %48 : vector<24x1xf32>
      %c0_30 = arith.constant 0 : index
      %c0_31 = arith.constant 0 : index
      %50 = vector.load %arg5[%c0_30, %c0_31] : memref<24x1xf32, #tpu.memory_space<vmem>>, vector<24x1xf32>
      tpu.vector_store %arg5[%c0_30, %c0_31], %49 {strides = array<i32>} : memref<24x1xf32, #tpu.memory_space<vmem>>, vector<24x1xf32>,
    } else {
    }
    return
  }
  func.func @transform_0(%arg0: i32, %arg1: i32) -> (i32, i32) {
    %c0_i32 = arith.constant 0 : i32
    %c0_i32_0 = arith.constant 0 : i32
    return %arg0, %c0_i32 : i32, i32
  }
  func.func @transform_1(%arg0: i32, %arg1: i32) -> (i32, i32) {
    %c0_i32 = arith.constant 0 : i32
    %c0_i32_0 = arith.constant 0 : i32
    return %arg0, %c0_i32 : i32, i32
  }
  func.func @transform_2(%arg0: i32, %arg1: i32) -> (i32, i32) {
    %c0_i32 = arith.constant 0 : i32
    %c0_i32_0 = arith.constant 0 : i32
    return %arg1, %c0_i32 : i32, i32
  }
  func.func @transform_3(%arg0: i32, %arg1: i32) -> (i32, i32) {
    %c0_i32 = arith.constant 0 : i32
    %c0_i32_0 = arith.constant 0 : i32
    return %arg0, %c0_i32 : i32, i32
  }
}

</mosaic_0001>

<bundles_post_ra>
// kernel: tpu_custom_call.1
= control target key start
LH: loop header
LB: loop body
LE: loop exit
PB: predicated region body
PF: predicated region fallthrough
CT: control target
= control target key end

     0   :  { %8 = vsyncpa [#allocation6], 0  ;;  %s2264_s15 = smov [#allocation5]   ;;  %s2265_s17 = smov 128   ;;  %s2696_s0 = inlined_call_operand.vmem [shape: s32[24,1], index: 0, kind: input, shape index: {}]   ;;  %s2697_s1 = inlined_call_operand.vmem [shape: bf16[24,256], index: 1, kind: input, shape index: {}]   ;;  %s2698_s2 = inlined_call_operand.hbm [shape: bf16[1024,256], index: 2, kind: input, shape index: {}]   ;;  %s2699_s3 = inlined_call_operand.vmem [shape: f32[24,1], index: 3, kind: output, shape index: {}]  }
   0x1   :  { %s17_s14 = sshll.u32 %s2698_s2, 4  ;;  %s19_s16 = sshll.u32 %s2264_s15, 4  ;;  %s18_s14 = int_to_ptr.hbm [resolvable:$true] %s17_s14  ;;  %s20_s16 = int_to_ptr.vmem [resolvable:$true] %s19_s16 }
   0x2   :  { %s2266_s18 = smov 8  }
   0x3   :  { %25 = dma.hbm_to_vmem [thread:$0]  %s18_s14, 16384, %s20_s16, [#allocation6], %s2265_s17, %s2265_s17, %s2266_s18  }
   0x4   :  { %2262 = dma.done.wait [#allocation6], 16384  }
   0x5   :  { %2263 = vsyncadd [#allocation6], 4294950912  ;;  %v1579_v0 = vld [vmem:[#allocation5 + $0x70] sm:$0xf]  ;;  %v2050_v1 = vld [vmem:[#allocation5 + $0x74] sm:$0xf0] }
   0x6   :  { %v2049_v2 = vld [vmem:[#allocation5 + $0x74] sm:$0xf]  ;;  %v1580_v3 = vor.u32 %v2050_v1, %v1579_v0  ;;  %v1581_v4 = vld [vmem:[#allocation5 + $0x78] sm:$0xf0]  ;;  %v1643_v5 = vld [vmem:[#allocation5 + $0xf0] sm:$0xf] }
   0x7   :  { %v2066_v6 = vld [vmem:[#allocation5 + $0xf4] sm:$0xf0]  ;;  %v1584_v7 = vor.u32 %v2049_v2, %v1581_v4  ;;  %v2065_v9 = vld [vmem:[#allocation5 + $0xf4] sm:$0xf]  ;;  %v1645_v10 = vld [vmem:[#allocation5 + $0xf8] sm:$0xf0] }
   0x8   :  { %v1644_v8 = vor.u32 %v2066_v6, %v1643_v5  ;;  %832 = vmatpush.bf16.xpose.msra.mxu0 %v1580_v3  ;;  %v1648_v11 = vor.u32 %v2065_v9, %v1645_v10  ;;  %v1571_v12 = vld [vmem:[#allocation5 + $0x60] sm:$0xf]  ;;  %v2048_v13 = vld [vmem:[#allocation5 + $0x64] sm:$0xf0]  ;;  %v2047_v14 = vld [vmem:[#allocation5 + $0x64] sm:$0xf] }
   0x9   :  { %850 = vmatpush.bf16.xpose.msra.mxu1 %v1584_v7  ;;  %v1573_v15 = vld [vmem:[#allocation5 + $0x68] sm:$0xf0]  ;;  %v1635_v16 = vld [vmem:[#allocation5 + $0xe0] sm:$0xf]  ;;  %v2064_v17 = vld [vmem:[#allocation5 + $0xe4] sm:$0xf0]  ;;  %v1572_v20 = vor.u32 %v2048_v13, %v1571_v12 }
   0xa   :  { %868 = vmatpush.bf16.xpose.msra.mxu2 %v1644_v8  ;;  %886 = vmatpush.bf16.xpose.msra.mxu3 %v1648_v11  ;;  %v2063_v18 = vld [vmem:[#allocation5 + $0xe4] sm:$0xf]  ;;  %v1637_v19 = vld [vmem:[#allocation5 + $0xe8] sm:$0xf0]  ;;  %v1576_v21 = vor.u32 %v2047_v14, %v1573_v15  ;;  %v1636_v22 = vor.u32 %v2064_v17, %v1635_v16  ;;  %v1563_v24 = vld [vmem:[#allocation5 + $0x50] sm:$0xf] }
   0xb   :  { %v1640_v23 = vor.u32 %v2063_v18, %v1637_v19  ;;  %v2046_v25 = vld [vmem:[#allocation5 + $0x54] sm:$0xf0]  ;;  %v2045_v26 = vld [vmem:[#allocation5 + $0x54] sm:$0xf]  ;;  %v1565_v27 = vld [vmem:[#allocation5 + $0x58] sm:$0xf0] }
   0xc   :  { %v1627_v28 = vld [vmem:[#allocation5 + $0xd0] sm:$0xf]  ;;  %v2062_v29 = vld [vmem:[#allocation5 + $0xd4] sm:$0xf0]  ;;  %v2061_v30 = vld [vmem:[#allocation5 + $0xd4] sm:$0xf]  ;;  %v1564_v32 = vor.u32 %v2046_v25, %v1563_v24  ;;  %v1568_v33 = vor.u32 %v2045_v26, %v1565_v27 }
   0xd   :  { %v1629_v31 = vld [vmem:[#allocation5 + $0xd8] sm:$0xf0]  ;;  %v1628_v34 = vor.u32 %v2062_v29, %v1627_v28  ;;  %v1555_v36 = vld [vmem:[#allocation5 + $0x40] sm:$0xf]  ;;  %v2044_v37 = vld [vmem:[#allocation5 + $0x44] sm:$0xf0] }
   0xe   :  { %v1632_v35 = vor.u32 %v2061_v30, %v1629_v31  ;;  %v2043_v38 = vld [vmem:[#allocation5 + $0x44] sm:$0xf]  ;;  %v1557_v39 = vld [vmem:[#allocation5 + $0x48] sm:$0xf0]  ;;  %v1619_v40 = vld [vmem:[#allocation5 + $0xc0] sm:$0xf]  ;;  %v1556_v44 = vor.u32 %v2044_v37, %v1555_v36 }
   0xf   :  { %v2060_v41 = vld [vmem:[#allocation5 + $0xc4] sm:$0xf0]  ;;  %v2059_v42 = vld [vmem:[#allocation5 + $0xc4] sm:$0xf]  ;;  %v1621_v43 = vld [vmem:[#allocation5 + $0xc8] sm:$0xf0]  ;;  %v1560_v45 = vor.u32 %v2043_v38, %v1557_v39 }
  0x10   :  { %833 = vmatpush.bf16.xpose.msra.mxu0 %v1572_v20  ;;  %v1620_v46 = vor.u32 %v2060_v41, %v1619_v40  ;;  %v1624_v47 = vor.u32 %v2059_v42, %v1621_v43  ;;  %v1547_v48 = vld [vmem:[#allocation5 + $0x30] sm:$0xf]  ;;  %v2042_v49 = vld [vmem:[#allocation5 + $0x34] sm:$0xf0]  ;;  %v2041_v50 = vld [vmem:[#allocation5 + $0x34] sm:$0xf] }
  0x11   :  { %851 = vmatpush.bf16.xpose.msra.mxu1 %v1576_v21  ;;  %v1549_v51 = vld [vmem:[#allocation5 + $0x38] sm:$0xf0]  ;;  %v1611_v52 = vld [vmem:[#allocation5 + $0xb0] sm:$0xf]  ;;  %v2058_v53 = vld [vmem:[#allocation5 + $0xb4] sm:$0xf0]  ;;  %v1548_v56 = vor.u32 %v2042_v49, %v1547_v48 }
  0x12   :  { %869 = vmatpush.bf16.xpose.msra.mxu2 %v1636_v22  ;;  %887 = vmatpush.bf16.xpose.msra.mxu3 %v1640_v23  ;;  %v2057_v54 = vld [vmem:[#allocation5 + $0xb4] sm:$0xf]  ;;  %v1613_v55 = vld [vmem:[#allocation5 + $0xb8] sm:$0xf0]  ;;  %v1552_v57 = vor.u32 %v2041_v50, %v1549_v51  ;;  %v1612_v58 = vor.u32 %v2058_v53, %v1611_v52  ;;  %v1539_v60 = vld [vmem:[#allocation5 + $0x20] sm:$0xf] }
  0x13   :  { %v1616_v59 = vor.u32 %v2057_v54, %v1613_v55  ;;  %v2040_v61 = vld [vmem:[#allocation5 + $0x24] sm:$0xf0]  ;;  %v2039_v62 = vld [vmem:[#allocation5 + $0x24] sm:$0xf]  ;;  %v1541_v63 = vld [vmem:[#allocation5 + $0x28] sm:$0xf0] }
  0x14   :  { %v1603_v0 = vld [vmem:[#allocation5 + $0xa0] sm:$0xf]  ;;  %v2056_v1 = vld [vmem:[#allocation5 + $0xa4] sm:$0xf0]  ;;  %v2055_v2 = vld [vmem:[#allocation5 + $0xa4] sm:$0xf]  ;;  %v1540_v4 = vor.u32 %v2040_v61, %v1539_v60  ;;  %v1544_v5 = vor.u32 %v2039_v62, %v1541_v63 }
  0x15   :  { %v1605_v3 = vld [vmem:[#allocation5 + $0xa8] sm:$0xf0]  ;;  %v1604_v6 = vor.u32 %v2056_v1, %v1603_v0  ;;  %v1531_v8 = vld [vmem:[#allocation5 + $0x10] sm:$0xf]  ;;  %v2038_v9 = vld [vmem:[#allocation5 + $0x14] sm:$0xf0] }
  0x16   :  { %v1608_v7 = vor.u32 %v2055_v2, %v1605_v3  ;;  %v2037_v10 = vld [vmem:[#allocation5 + $0x14] sm:$0xf]  ;;  %v1533_v11 = vld [vmem:[#allocation5 + $0x18] sm:$0xf0]  ;;  %v1595_v12 = vld [vmem:[#allocation5 + $0x90] sm:$0xf]  ;;  %v1532_v16 = vor.u32 %v2038_v9, %v1531_v8 }
  0x17   :  { %v2054_v13 = vld [vmem:[#allocation5 + $0x94] sm:$0xf0]  ;;  %v2053_v14 = vld [vmem:[#allocation5 + $0x94] sm:$0xf]  ;;  %v1597_v15 = vld [vmem:[#allocation5 + $0x98] sm:$0xf0]  ;;  %v1536_v17 = vor.u32 %v2037_v10, %v1533_v11 }
  0x18   :  { %834 = vmatpush.bf16.xpose.msra.mxu0 %v1564_v32  ;;  %v1596_v18 = vor.u32 %v2054_v13, %v1595_v12  ;;  %v1600_v19 = vor.u32 %v2053_v14, %v1597_v15  ;;  %v1523_v20 = vld [vmem:[#allocation5] sm:$0xf]  ;;  %v2036_v21 = vld [vmem:[#allocation5 + $0x4] sm:$0xf0]  ;;  %v2035_v22 = vld [vmem:[#allocation5 + $0x4] sm:$0xf] }
  0x19   :  { %852 = vmatpush.bf16.xpose.msra.mxu1 %v1568_v33  ;;  %v1525_v23 = vld [vmem:[#allocation5 + $0x8] sm:$0xf0]  ;;  %v1587_v24 = vld [vmem:[#allocation5 + $0x80] sm:$0xf]  ;;  %v2052_v25 = vld [vmem:[#allocation5 + $0x84] sm:$0xf0]  ;;  %v1524_v31 = vor.u32 %v2036_v21, %v1523_v20 }
  0x1a   :  { %870 = vmatpush.bf16.xpose.msra.mxu2 %v1628_v34  ;;  %888 = vmatpush.bf16.xpose.msra.mxu3 %v1632_v35  ;;  %v2051_v26 = vld [vmem:[#allocation5 + $0x84] sm:$0xf]  ;;  %v1589_v27 = vld [vmem:[#allocation5 + $0x88] sm:$0xf0]  ;;  %v1707_v28 = vld [vmem:[#allocation5 + $0x170] sm:$0xf]  ;;  %v1528_v35 = vor.u32 %v2035_v22, %v1525_v23  ;;  %v1588_v36 = vor.u32 %v2052_v25, %v1587_v24 }
  0x1b   :  { %v2082_v29 = vld [vmem:[#allocation5 + $0x174] sm:$0xf0]  ;;  %v2081_v30 = vld [vmem:[#allocation5 + $0x174] sm:$0xf]  ;;  %v1709_v32 = vld [vmem:[#allocation5 + $0x178] sm:$0xf0]  ;;  %v1592_v39 = vor.u32 %v2051_v26, %v1589_v27 }
  0x1c   :  { %v1771_v33 = vld [vmem:[#allocation5 + $0x1f0] sm:$0xf]  ;;  %v2098_v34 = vld [vmem:[#allocation5 + $0x1f4] sm:$0xf0]  ;;  %v2097_v37 = vld [vmem:[#allocation5 + $0x1f4] sm:$0xf]  ;;  %v1708_v40 = vor.u32 %v2082_v29, %v1707_v28  ;;  %v1712_v41 = vor.u32 %v2081_v30, %v1709_v32 }
  0x1d   :  { %v1773_v38 = vld [vmem:[#allocation5 + $0x1f8] sm:$0xf0]  ;;  %v1772_v42 = vor.u32 %v2098_v34, %v1771_v33  ;;  %v1699_v48 = vld [vmem:[#allocation5 + $0x160] sm:$0xf]  ;;  %v2080_v49 = vld [vmem:[#allocation5 + $0x164] sm:$0xf0] }
  0x1e   :  { %v1776_v43 = vor.u32 %v2097_v37, %v1773_v38  ;;  %v2079_v50 = vld [vmem:[#allocation5 + $0x164] sm:$0xf]  ;;  %v1701_v52 = vld [vmem:[#allocation5 + $0x168] sm:$0xf0]  ;;  %v1763_v53 = vld [vmem:[#allocation5 + $0x1e0] sm:$0xf] }
  0x1f   :  { %v2096_v54 = vld [vmem:[#allocation5 + $0x1e4] sm:$0xf0]  ;;  %v1691_v62 = vld [vmem:[#allocation5 + $0x150] sm:$0xf]  ;;  %v2078_v63 = vld [vmem:[#allocation5 + $0x154] sm:$0xf0] }
  0x20   :  { %835 = vmatpush.bf16.xpose.msra.mxu0 %v1556_v44  ;;  %v1515_v44 = vld [vmem:[%s2697_s1] sm:$0xf]  ;;  %v1764_v60 = vor.u32 %v2096_v54, %v1763_v53  ;;  %v2077_v0 = vld [vmem:[#allocation5 + $0x154] sm:$0xf]  ;;  %v1693_v1 = vld [vmem:[#allocation5 + $0x158] sm:$0xf0] }
  0x21   :  { %853 = vmatpush.bf16.xpose.msra.mxu1 %v1560_v45  ;;  %v2034_v45 = vld [vmem:[%s2697_s1 + $0x4] sm:$0xf0]  ;;  %v1755_v2 = vld [vmem:[#allocation5 + $0x1d0] sm:$0xf]  ;;  %v2094_v3 = vld [vmem:[#allocation5 + $0x1d4] sm:$0xf0]  ;;  %v1696_v8 = vor.u32 %v2077_v0, %v1693_v1 }
  0x22   :  { %871 = vmatpush.bf16.xpose.msra.mxu2 %v1620_v46  ;;  %889 = vmatpush.bf16.xpose.msra.mxu3 %v1624_v47  ;;  %v2033_v46 = vld [vmem:[%s2697_s1 + $0x4] sm:$0xf]  ;;  %v1517_v47 = vld [vmem:[%s2697_s1 + $0x8] sm:$0xf0]  ;;  %v2305_v51 = vor.u32 %v2034_v45, %v1515_v44  ;;  %v1756_v9 = vor.u32 %v2094_v3, %v1755_v2  ;;  %v1683_v13 = vld [vmem:[#allocation5 + $0x140] sm:$0xf] }
  0x23   :  { %v2307_v55 = vor.u32 %v2033_v46, %v1517_v47  ;;  %v2076_v14 = vld [vmem:[#allocation5 + $0x144] sm:$0xf0]  ;;  %v2075_v15 = vld [vmem:[#allocation5 + $0x144] sm:$0xf]  ;;  %v1749_v22 = vld [vmem:[#allocation5 + $0x1c8] sm:$0xf0] }
  0x24   :  { %v2091_v21 = vld [vmem:[#allocation5 + $0x1c4] sm:$0xf]  ;;  %v1684_v23 = vor.u32 %v2076_v14, %v1683_v13  ;;  %v1675_v27 = vld [vmem:[#allocation5 + $0x130] sm:$0xf]  ;;  %v2074_v28 = vld [vmem:[#allocation5 + $0x134] sm:$0xf0] }
  0x25   :  { %v1752_v26 = vor.u32 %v2091_v21, %v1749_v22  ;;  %v2073_v29 = vld [vmem:[#allocation5 + $0x134] sm:$0xf]  ;;  %v1677_v30 = vld [vmem:[#allocation5 + $0x138] sm:$0xf0]  ;;  %v2090_v32 = vld [vmem:[#allocation5 + $0x1b4] sm:$0xf0] }
  0x26   :  { %v2089_v33 = vld [vmem:[#allocation5 + $0x1b4] sm:$0xf]  ;;  %v1741_v34 = vld [vmem:[#allocation5 + $0x1b8] sm:$0xf0]  ;;  %v2088_v44 = vld [vmem:[#allocation5 + $0x1a4] sm:$0xf0] }
  0x27   :  { %v1744_v38 = vor.u32 %v2089_v33, %v1741_v34  ;;  %v2087_v45 = vld [vmem:[#allocation5 + $0x1a4] sm:$0xf]  ;;  %v1733_v46 = vld [vmem:[#allocation5 + $0x1a8] sm:$0xf0]  ;;  %v2070_v53 = vld [vmem:[#allocation5 + $0x114] sm:$0xf0] }
  0x28   :  { %836 = vmatpush.bf16.xpose.msra.mxu0 %v1548_v56  ;;  %v2095_v56 = vld [vmem:[#allocation5 + $0x1e4] sm:$0xf]  ;;  %v2069_v54 = vld [vmem:[#allocation5 + $0x114] sm:$0xf]  ;;  %v1651_v1 = vld [vmem:[#allocation5 + $0x100] sm:$0xf] }
  0x29   :  { %854 = vmatpush.bf16.xpose.msra.mxu1 %v1552_v57  ;;  %v1765_v57 = vld [vmem:[#allocation5 + $0x1e8] sm:$0xf0]  ;;  %v2068_v2 = vld [vmem:[#allocation5 + $0x104] sm:$0xf0]  ;;  %v2067_v3 = vld [vmem:[#allocation5 + $0x104] sm:$0xf] }
  0x2a   :  { %872 = vmatpush.bf16.xpose.msra.mxu2 %v1612_v58  ;;  %890 = vmatpush.bf16.xpose.msra.mxu3 %v1616_v59  ;;  %v1700_v58 = vor.u32 %v2080_v49, %v1699_v48  ;;  %v1704_v59 = vor.u32 %v2079_v50, %v1701_v52  ;;  %v1768_v61 = vor.u32 %v2095_v56, %v1765_v57  ;;  %v1659_v52 = vld [vmem:[#allocation5 + $0x110] sm:$0xf]  ;;  %v1661_v56 = vld [vmem:[#allocation5 + $0x118] sm:$0xf0]  ;;  %v2127_v33 = vld [vmem:[#allocation5 + $0x2e4] sm:$0xf] }
  0x2b   :  { %v1736_v50 = vor.u32 %v2087_v45, %v1733_v46  ;;  %v1723_v57 = vld [vmem:[#allocation5 + $0x190] sm:$0xf]  ;;  %v1837_v13 = vld [vmem:[#allocation5 + $0x278] sm:$0xf0]  ;;  %v1893_v34 = vld [vmem:[#allocation5 + $0x2e8] sm:$0xf0] }
  0x2c   :  { %v1899_v14 = vld [vmem:[#allocation5 + $0x2f0] sm:$0xf]  ;;  %v1901_v21 = vld [vmem:[#allocation5 + $0x2f8] sm:$0xf0]  ;;  %v2125_v45 = vld [vmem:[#allocation5 + $0x2d4] sm:$0xf] }
  0x2d   :  { %v1885_v46 = vld [vmem:[#allocation5 + $0x2d8] sm:$0xf0]  ;;  %vm34_vm0 = vcmask 7168  }
  0x30   :  { %837 = vmatpush.bf16.xpose.msra.mxu0 %v1540_v4  ;;  %v46_v4 = vld [vmem:[%s2697_s1 + $0x10] sm:$0xff] }
  0x31   :  { %855 = vmatpush.bf16.xpose.msra.mxu1 %v1544_v5  ;;  %v2093_v5 = vld [vmem:[#allocation5 + $0x1d4] sm:$0xf]  ;;  %v182_v10 = vunpack.c.l.b16 %v46_v4  ;;  %v183_v12 = vunpack.c.h.b16 %v46_v4  ;;  %v1653_v4 = vld [vmem:[#allocation5 + $0x108] sm:$0xf0] }
  0x32   :  { %873 = vmatpush.bf16.xpose.msra.mxu2 %v1604_v6  ;;  %891 = vmatpush.bf16.xpose.msra.mxu3 %v1608_v7  ;;  %v1757_v6 = vld [vmem:[#allocation5 + $0x1d8] sm:$0xf0]  ;;  %v1692_v7 = vor.u32 %v2078_v63, %v1691_v62  ;;  %v1664_v62 = vor.u32 %v2069_v54, %v1661_v56  ;;  %v2107_v54 = vld [vmem:[#allocation5 + $0x244] sm:$0xf]  ;;  %v1813_v56 = vld [vmem:[#allocation5 + $0x248] sm:$0xf0] }
  0x33   :  { %v1760_v11 = vor.u32 %v2093_v5, %v1757_v6  ;;  %v2318_v20 = vpack.c.b16 %v183_v12, %v183_v12  ;;  %v1715_v5 = vld [vmem:[#allocation5 + $0x180] sm:$0xf]  ;;  %v2084_v6 = vld [vmem:[#allocation5 + $0x184] sm:$0xf0]  ;;  %v1652_v12 = vor.u32 %v2068_v2, %v1651_v1  ;;  %v1803_v1 = vld [vmem:[#allocation5 + $0x230] sm:$0xf] }
  0x34   :  { %v2106_v2 = vld [vmem:[#allocation5 + $0x234] sm:$0xf0] }
  0x38   :  { %838 = vmatpush.bf16.xpose.msra.mxu0 %v1532_v16  ;;  %v2316_v16 = vpack.c.b16 %v182_v10, %v182_v10  ;;  %v2114_v10 = vld [vmem:[#allocation5 + $0x274] sm:$0xf0] }
  0x39   :  { %856 = vmatpush.bf16.xpose.msra.mxu1 %v1536_v17  ;;  %v1685_v17 = vld [vmem:[#allocation5 + $0x148] sm:$0xf0] }
  0x3a   :  { %874 = vmatpush.bf16.xpose.msra.mxu2 %v1596_v18  ;;  %892 = vmatpush.bf16.xpose.msra.mxu3 %v1600_v19  ;;  %v1747_v18 = vld [vmem:[#allocation5 + $0x1c0] sm:$0xf]  ;;  %v2092_v19 = vld [vmem:[#allocation5 + $0x1c4] sm:$0xf0]  ;;  %v1688_v24 = vor.u32 %v2075_v15, %v1685_v17  ;;  %v2130_v15 = vld [vmem:[#allocation5 + $0x2f4] sm:$0xf0]  ;;  %v1656_v17 = vor.u32 %v2067_v3, %v1653_v4 }
  0x3b   :  { %v1748_v25 = vor.u32 %v2092_v19, %v1747_v18  ;;  %v1716_v18 = vor.u32 %v2084_v6, %v1715_v5  ;;  %v2129_v19 = vld [vmem:[#allocation5 + $0x2f4] sm:$0xf]  ;;  %v1805_v4 = vld [vmem:[#allocation5 + $0x238] sm:$0xf0]  ;;  %v1867_v5 = vld [vmem:[#allocation5 + $0x2b0] sm:$0xf] }
  0x3c   :  { %v2105_v3 = vld [vmem:[#allocation5 + $0x234] sm:$0xf]  ;;  %v2122_v6 = vld [vmem:[#allocation5 + $0x2b4] sm:$0xf0] }
  0x40   :  { %839 = vmatpush.bf16.xpose.msra.mxu0 %v1524_v31  ;;  %v1739_v31 = vld [vmem:[#allocation5 + $0x1b0] sm:$0xf] }
  0x41   :  { %857 = vmatpush.bf16.xpose.msra.mxu1 %v1528_v35  ;;  %v1676_v35 = vor.u32 %v2074_v28, %v1675_v27  ;;  %v1740_v37 = vor.u32 %v2090_v32, %v1739_v31  ;;  %v1827_v27 = vld [vmem:[#allocation5 + $0x260] sm:$0xf]  ;;  %v2112_v28 = vld [vmem:[#allocation5 + $0x264] sm:$0xf0] }
  0x42   :  { %875 = vmatpush.bf16.xpose.msra.mxu2 %v1588_v36  ;;  %893 = vmatpush.bf16.xpose.msra.mxu3 %v1592_v39  ;;  %v1680_v36 = vor.u32 %v2073_v29, %v1677_v30  ;;  %v1667_v39 = vld [vmem:[#allocation5 + $0x120] sm:$0xf]  ;;  %v2111_v29 = vld [vmem:[#allocation5 + $0x264] sm:$0xf]  ;;  %v1829_v30 = vld [vmem:[#allocation5 + $0x268] sm:$0xf0] }
  0x43   :  { %v1891_v31 = vld [vmem:[#allocation5 + $0x2e0] sm:$0xf]  ;;  %v2128_v32 = vld [vmem:[#allocation5 + $0x2e4] sm:$0xf0] }
  0x47   :  { %840 = vmatmul.bf16.vlgmr.msra.gmra.mxu0 %v2305_v51 }
  0x48   :  { %904 = vmatpush.bf16.xpose.msrb.mxu0 %v1708_v40  ;;  %858 = vmatmul.bf16.vlgmr.msra.gmra.mxu1 %v2307_v55  ;;  %v2072_v40 = vld [vmem:[#allocation5 + $0x124] sm:$0xf0] }
  0x49   :  { %922 = vmatpush.bf16.xpose.msrb.mxu1 %v1712_v41  ;;  %876 = vmatmul.bf16.vlgmr.msra.gmra.mxu2 %v2305_v51  ;;  %v2071_v41 = vld [vmem:[#allocation5 + $0x124] sm:$0xf]  ;;  %v1668_v47 = vor.u32 %v2072_v40, %v1667_v39  ;;  %v1819_v39 = vld [vmem:[#allocation5 + $0x250] sm:$0xf]  ;;  %v2110_v40 = vld [vmem:[#allocation5 + $0x254] sm:$0xf0] }
  0x4a   :  { %940 = vmatpush.bf16.xpose.msrb.mxu2 %v1772_v42  ;;  %958 = vmatpush.bf16.xpose.msrb.mxu3 %v1776_v43  ;;  %v1669_v42 = vld [vmem:[#allocation5 + $0x128] sm:$0xf0]  ;;  %v1731_v43 = vld [vmem:[#allocation5 + $0x1a0] sm:$0xf] }
  0x4b   :  { %894 = vmatmul.bf16.vlgmr.msra.gmra.mxu3 %v2307_v55  ;;  %v1672_v48 = vor.u32 %v2071_v41, %v1669_v42  ;;  %v1732_v49 = vor.u32 %v2088_v44, %v1731_v43  ;;  %v2109_v41 = vld [vmem:[#allocation5 + $0x254] sm:$0xf]  ;;  %v1821_v42 = vld [vmem:[#allocation5 + $0x258] sm:$0xf0]  ;;  %v1883_v43 = vld [vmem:[#allocation5 + $0x2d0] sm:$0xf] }
  0x4c   :  { %v2126_v44 = vld [vmem:[#allocation5 + $0x2d4] sm:$0xf0] }
  0x50   :  { %905 = vmatpush.bf16.xpose.msrb.mxu0 %v1700_v58  ;;  %v2086_v58 = vld [vmem:[#allocation5 + $0x194] sm:$0xf0] }
  0x51   :  { %923 = vmatpush.bf16.xpose.msrb.mxu1 %v1704_v59  ;;  %v2085_v59 = vld [vmem:[#allocation5 + $0x194] sm:$0xf]  ;;  %v1724_v63 = vor.u32 %v2086_v58, %v1723_v57  ;;  %v1875_v57 = vld [vmem:[#allocation5 + $0x2c0] sm:$0xf]  ;;  %v2124_v58 = vld [vmem:[#allocation5 + $0x2c4] sm:$0xf0] }
  0x52   :  { %941 = vmatpush.bf16.xpose.msrb.mxu2 %v1764_v60  ;;  %959 = vmatpush.bf16.xpose.msrb.mxu3 %v1768_v61  ;;  %v1725_v60 = vld [vmem:[#allocation5 + $0x198] sm:$0xf0]  ;;  %v1660_v61 = vor.u32 %v2070_v53, %v1659_v52  ;;  %v1811_v52 = vld [vmem:[#allocation5 + $0x240] sm:$0xf]  ;;  %v2108_v53 = vld [vmem:[#allocation5 + $0x244] sm:$0xf0] }
  0x53   :  { %v1728_v0 = vor.u32 %v2085_v59, %v1725_v60  ;;  %v2123_v59 = vld [vmem:[#allocation5 + $0x2c4] sm:$0xf]  ;;  %v1877_v60 = vld [vmem:[#allocation5 + $0x2c8] sm:$0xf0] }
  0x57   :  { %845 = vmatmul.bf16.gmra.mxu0 %v2316_v16 }
  0x58   :  { %906 = vmatpush.bf16.xpose.msrb.mxu0 %v1692_v7  ;;  %863 = vmatmul.bf16.gmra.mxu1 %v2318_v20  ;;  %v2083_v7 = vld [vmem:[#allocation5 + $0x184] sm:$0xf] }
  0x59   :  { %924 = vmatpush.bf16.xpose.msrb.mxu1 %v1696_v8  ;;  %881 = vmatmul.bf16.gmra.mxu2 %v2316_v16  ;;  %v1717_v8 = vld [vmem:[#allocation5 + $0x188] sm:$0xf0] }
  0x5a   :  { %942 = vmatpush.bf16.xpose.msrb.mxu2 %v1756_v9  ;;  %960 = vmatpush.bf16.xpose.msrb.mxu3 %v1760_v11  ;;  %v1835_v9 = vld [vmem:[#allocation5 + $0x270] sm:$0xf]  ;;  %v2113_v11 = vld [vmem:[#allocation5 + $0x274] sm:$0xf]  ;;  %v1720_v22 = vor.u32 %v2083_v7, %v1717_v8  ;;  %v1869_v8 = vld [vmem:[#allocation5 + $0x2b8] sm:$0xf0] }
  0x5b   :  { %899 = vmatmul.bf16.gmra.mxu3 %v2318_v20  ;;  %v2121_v7 = vld [vmem:[#allocation5 + $0x2b4] sm:$0xf] }
  0x60   :  { %907 = vmatpush.bf16.xpose.msrb.mxu0 %v1684_v23  ;;  %v1836_v23 = vor.u32 %v2114_v10, %v1835_v9  ;;  %v1804_v9 = vor.u32 %v2106_v2, %v1803_v1  ;;  %v1808_v10 = vor.u32 %v2105_v3, %v1805_v4  ;;  %v1955_v1 = vld [vmem:[#allocation5 + $0x360] sm:$0xf]  ;;  %v2144_v2 = vld [vmem:[#allocation5 + $0x364] sm:$0xf0]  ;;  %v2143_v3 = vld [vmem:[#allocation5 + $0x364] sm:$0xf] }
  0x61   :  { %925 = vmatpush.bf16.xpose.msrb.mxu1 %v1688_v24  ;;  %v1840_v24 = vor.u32 %v2113_v11, %v1837_v13  ;;  %v1868_v11 = vor.u32 %v2122_v6, %v1867_v5  ;;  %v1795_v13 = vld [vmem:[#allocation5 + $0x220] sm:$0xf]  ;;  %v1957_v4 = vld [vmem:[#allocation5 + $0x368] sm:$0xf0]  ;;  %v2160_v6 = vld [vmem:[#allocation5 + $0x3e4] sm:$0xf0] }
  0x62   :  { %943 = vmatpush.bf16.xpose.msrb.mxu2 %v1748_v25  ;;  %961 = vmatpush.bf16.xpose.msrb.mxu3 %v1752_v26  ;;  %v1900_v25 = vor.u32 %v2130_v15, %v1899_v14  ;;  %v1904_v26 = vor.u32 %v2129_v19, %v1901_v21  ;;  %v2104_v14 = vld [vmem:[#allocation5 + $0x224] sm:$0xf0]  ;;  %v2103_v15 = vld [vmem:[#allocation5 + $0x224] sm:$0xf]  ;;  %v2019_v5 = vld [vmem:[#allocation5 + $0x3e0] sm:$0xf] }
  0x63   :  { %v2120_v19 = vld [vmem:[#allocation5 + $0x2a4] sm:$0xf0]  ;;  %v2119_v21 = vld [vmem:[#allocation5 + $0x2a4] sm:$0xf] }
  0x68   :  { %908 = vmatpush.bf16.xpose.msrb.mxu0 %v1676_v35  ;;  %v1828_v35 = vor.u32 %v2112_v28, %v1827_v27  ;;  %v1787_v27 = vld [vmem:[#allocation5 + $0x210] sm:$0xf]  ;;  %v2102_v28 = vld [vmem:[#allocation5 + $0x214] sm:$0xf0] }
  0x69   :  { %926 = vmatpush.bf16.xpose.msrb.mxu1 %v1680_v36  ;;  %v1832_v36 = vor.u32 %v2111_v29, %v1829_v30  ;;  %v2101_v29 = vld [vmem:[#allocation5 + $0x214] sm:$0xf]  ;;  %v1789_v30 = vld [vmem:[#allocation5 + $0x218] sm:$0xf0] }
  0x6a   :  { %944 = vmatpush.bf16.xpose.msrb.mxu2 %v1740_v37  ;;  %962 = vmatpush.bf16.xpose.msrb.mxu3 %v1744_v38  ;;  %v1892_v37 = vor.u32 %v2128_v32, %v1891_v31  ;;  %v1896_v38 = vor.u32 %v2127_v33, %v1893_v34  ;;  %v1851_v31 = vld [vmem:[#allocation5 + $0x290] sm:$0xf]  ;;  %v2118_v32 = vld [vmem:[#allocation5 + $0x294] sm:$0xf0]  ;;  %v2117_v33 = vld [vmem:[#allocation5 + $0x294] sm:$0xf] }
  0x6b   :  { %v1853_v34 = vld [vmem:[#allocation5 + $0x298] sm:$0xf0] }
  0x70   :  { %909 = vmatpush.bf16.xpose.msrb.mxu0 %v1668_v47  ;;  %v1820_v47 = vor.u32 %v2110_v40, %v1819_v39  ;;  %v1779_v39 = vld [vmem:[#allocation5 + $0x200] sm:$0xf]  ;;  %v2100_v40 = vld [vmem:[#allocation5 + $0x204] sm:$0xf0] }
  0x71   :  { %927 = vmatpush.bf16.xpose.msrb.mxu1 %v1672_v48  ;;  %v1824_v48 = vor.u32 %v2109_v41, %v1821_v42  ;;  %v2099_v41 = vld [vmem:[#allocation5 + $0x204] sm:$0xf]  ;;  %v1781_v42 = vld [vmem:[#allocation5 + $0x208] sm:$0xf0] }
  0x72   :  { %945 = vmatpush.bf16.xpose.msrb.mxu2 %v1732_v49  ;;  %963 = vmatpush.bf16.xpose.msrb.mxu3 %v1736_v50  ;;  %v1884_v49 = vor.u32 %v2126_v44, %v1883_v43  ;;  %v1888_v50 = vor.u32 %v2125_v45, %v1885_v46  ;;  %v1843_v43 = vld [vmem:[#allocation5 + $0x280] sm:$0xf]  ;;  %v2116_v44 = vld [vmem:[#allocation5 + $0x284] sm:$0xf0]  ;;  %v2115_v45 = vld [vmem:[#allocation5 + $0x284] sm:$0xf] }
  0x73   :  { %v1845_v46 = vld [vmem:[#allocation5 + $0x288] sm:$0xf0] }
  0x78   :  { %910 = vmatpush.bf16.xpose.msrb.mxu0 %v1660_v61  ;;  %v1812_v61 = vor.u32 %v2108_v53, %v1811_v52  ;;  %v1965_v52 = vld [vmem:[#allocation5 + $0x378] sm:$0xf0]  ;;  %v2027_v53 = vld [vmem:[#allocation5 + $0x3f0] sm:$0xf] }
  0x79   :  { %928 = vmatpush.bf16.xpose.msrb.mxu1 %v1664_v62  ;;  %v1816_v62 = vor.u32 %v2107_v54, %v1813_v56  ;;  %v2162_v54 = vld [vmem:[#allocation5 + $0x3f4] sm:$0xf0]  ;;  %v1784_v56 = vor.u32 %v2099_v41, %v1781_v42 }
  0x7a   :  { %946 = vmatpush.bf16.xpose.msrb.mxu2 %v1724_v63  ;;  %964 = vmatpush.bf16.xpose.msrb.mxu3 %v1728_v0  ;;  %v1876_v63 = vor.u32 %v2124_v58, %v1875_v57  ;;  %v1880_v0 = vor.u32 %v2123_v59, %v1877_v60  ;;  %v1844_v57 = vor.u32 %v2116_v44, %v1843_v43  ;;  %v2161_v58 = vld [vmem:[#allocation5 + $0x3f4] sm:$0xf]  ;;  %v2029_v59 = vld [vmem:[#allocation5 + $0x3f8] sm:$0xf0] }
  0x7b   :  { %v1848_v60 = vor.u32 %v2115_v45, %v1845_v46 }
  0x80   :  { %911 = vmatpush.bf16.xpose.msrb.mxu0 %v1652_v12  ;;  %v1872_v12 = vor.u32 %v2121_v7, %v1869_v8  ;;  %v2159_v7 = vld [vmem:[#allocation5 + $0x3e4] sm:$0xf]  ;;  %v2021_v8 = vld [vmem:[#allocation5 + $0x3e8] sm:$0xf0] }
  0x81   :  { %929 = vmatpush.bf16.xpose.msrb.mxu1 %v1656_v17  ;;  %v1797_v17 = vld [vmem:[#allocation5 + $0x228] sm:$0xf0] }
  0x82   :  { %947 = vmatpush.bf16.xpose.msrb.mxu2 %v1716_v18  ;;  %965 = vmatpush.bf16.xpose.msrb.mxu3 %v1720_v22  ;;  %v1859_v18 = vld [vmem:[#allocation5 + $0x2a0] sm:$0xf]  ;;  %v1861_v22 = vld [vmem:[#allocation5 + $0x2a8] sm:$0xf0] }
  0x87   :  { %912 = vmatmul.bf16.vlgmr.msrb.gmra.mxu0 %v2305_v51 }
  0x88   :  { %976 = vmatpush.bf16.xpose.msra.mxu0 %v1836_v23  ;;  %930 = vmatmul.bf16.vlgmr.msrb.gmra.mxu1 %v2307_v55  ;;  %v1796_v23 = vor.u32 %v2104_v14, %v1795_v13  ;;  %v1947_v13 = vld [vmem:[#allocation5 + $0x350] sm:$0xf]  ;;  %v2142_v14 = vld [vmem:[#allocation5 + $0x354] sm:$0xf0] }
  0x89   :  { %994 = vmatpush.bf16.xpose.msra.mxu1 %v1840_v24  ;;  %948 = vmatmul.bf16.vlgmr.msrb.gmra.mxu2 %v2305_v51  ;;  %v1800_v24 = vor.u32 %v2103_v15, %v1797_v17  ;;  %v2141_v15 = vld [vmem:[#allocation5 + $0x354] sm:$0xf]  ;;  %v1949_v17 = vld [vmem:[#allocation5 + $0x358] sm:$0xf0] }
  0x8a   :  { %1012 = vmatpush.bf16.xpose.msra.mxu2 %v1900_v25  ;;  %1030 = vmatpush.bf16.xpose.msra.mxu3 %v1904_v26  ;;  %v1860_v25 = vor.u32 %v2120_v19, %v1859_v18  ;;  %v1864_v26 = vor.u32 %v2119_v21, %v1861_v22  ;;  %v2011_v18 = vld [vmem:[#allocation5 + $0x3d0] sm:$0xf]  ;;  %v2158_v19 = vld [vmem:[#allocation5 + $0x3d4] sm:$0xf0]  ;;  %v2157_v21 = vld [vmem:[#allocation5 + $0x3d4] sm:$0xf] }
  0x8b   :  { %966 = vmatmul.bf16.vlgmr.msrb.gmra.mxu3 %v2307_v55  ;;  %v2013_v22 = vld [vmem:[#allocation5 + $0x3d8] sm:$0xf0] }
  0x90   :  { %977 = vmatpush.bf16.xpose.msra.mxu0 %v1828_v35  ;;  %v1788_v35 = vor.u32 %v2102_v28, %v1787_v27 }
  0x91   :  { %995 = vmatpush.bf16.xpose.msra.mxu1 %v1832_v36  ;;  %v1792_v36 = vor.u32 %v2101_v29, %v1789_v30  ;;  %v1939_v30 = vld [vmem:[#allocation5 + $0x340] sm:$0xf] }
  0x92   :  { %1013 = vmatpush.bf16.xpose.msra.mxu2 %v1892_v37  ;;  %1031 = vmatpush.bf16.xpose.msra.mxu3 %v1896_v38  ;;  %v1852_v37 = vor.u32 %v2118_v32, %v1851_v31  ;;  %v1856_v38 = vor.u32 %v2117_v33, %v1853_v34  ;;  %v2140_v31 = vld [vmem:[#allocation5 + $0x344] sm:$0xf0]  ;;  %v2139_v32 = vld [vmem:[#allocation5 + $0x344] sm:$0xf]  ;;  %v1941_v33 = vld [vmem:[#allocation5 + $0x348] sm:$0xf0] }
  0x93   :  { %v2003_v34 = vld [vmem:[#allocation5 + $0x3c0] sm:$0xf] }
  0x97   :  { %917 = vmatmul.bf16.gmra.mxu0 %v2316_v16 }
  0x98   :  { %978 = vmatpush.bf16.xpose.msra.mxu0 %v1820_v47  ;;  %935 = vmatmul.bf16.gmra.mxu1 %v2318_v20  ;;  %v1963_v47 = vld [vmem:[#allocation5 + $0x370] sm:$0xf] }
  0x99   :  { %996 = vmatpush.bf16.xpose.msra.mxu1 %v1824_v48  ;;  %953 = vmatmul.bf16.gmra.mxu2 %v2316_v16  ;;  %v2146_v48 = vld [vmem:[#allocation5 + $0x374] sm:$0xf0] }
  0x9a   :  { %1014 = vmatpush.bf16.xpose.msra.mxu2 %v1884_v49  ;;  %1032 = vmatpush.bf16.xpose.msra.mxu3 %v1888_v50  ;;  %v2145_v49 = vld [vmem:[#allocation5 + $0x374] sm:$0xf]  ;;  %v1780_v50 = vor.u32 %v2100_v40, %v1779_v39  ;;  %v1944_v39 = vor.u32 %v2139_v32, %v1941_v33 }
  0x9b   :  { %971 = vmatmul.bf16.gmra.mxu3 %v2318_v20 }
  0xa0   :  { %979 = vmatpush.bf16.xpose.msra.mxu0 %v1812_v61  ;;  %v1964_v61 = vor.u32 %v2146_v48, %v1963_v47  ;;  %v1931_v48 = vld [vmem:[#allocation5 + $0x330] sm:$0xf] }
  0xa1   :  { %997 = vmatpush.bf16.xpose.msra.mxu1 %v1816_v62  ;;  %v1968_v62 = vor.u32 %v2145_v49, %v1965_v52  ;;  %v2138_v49 = vld [vmem:[#allocation5 + $0x334] sm:$0xf0]  ;;  %v1933_v52 = vld [vmem:[#allocation5 + $0x338] sm:$0xf0] }
  0xa2   :  { %1015 = vmatpush.bf16.xpose.msra.mxu2 %v1876_v63  ;;  %1033 = vmatpush.bf16.xpose.msra.mxu3 %v1880_v0  ;;  %v2028_v63 = vor.u32 %v2162_v54, %v2027_v53  ;;  %v2032_v0 = vor.u32 %v2161_v58, %v2029_v59  ;;  %v1995_v53 = vld [vmem:[#allocation5 + $0x3b0] sm:$0xf]  ;;  %v2154_v54 = vld [vmem:[#allocation5 + $0x3b4] sm:$0xf0]  ;;  %v1932_v58 = vor.u32 %v2138_v49, %v1931_v48 }
  0xa8   :  { %980 = vmatpush.bf16.xpose.msra.mxu0 %v1804_v9  ;;  %v1956_v9 = vor.u32 %v2144_v2, %v1955_v1 }
  0xa9   :  { %998 = vmatpush.bf16.xpose.msra.mxu1 %v1808_v10  ;;  %v1960_v10 = vor.u32 %v2143_v3, %v1957_v4  ;;  %v1923_v4 = vld [vmem:[#allocation5 + $0x320] sm:$0xf] }
  0xaa   :  { %1016 = vmatpush.bf16.xpose.msra.mxu2 %v1868_v11  ;;  %1034 = vmatpush.bf16.xpose.msra.mxu3 %v1872_v12  ;;  %v2020_v11 = vor.u32 %v2160_v6, %v2019_v5  ;;  %v2024_v12 = vor.u32 %v2159_v7, %v2021_v8  ;;  %v2136_v5 = vld [vmem:[#allocation5 + $0x324] sm:$0xf0]  ;;  %v2135_v6 = vld [vmem:[#allocation5 + $0x324] sm:$0xf]  ;;  %v1925_v7 = vld [vmem:[#allocation5 + $0x328] sm:$0xf0] }
  0xab   :  { %v1987_v8 = vld [vmem:[#allocation5 + $0x3a0] sm:$0xf] }
  0xb0   :  { %981 = vmatpush.bf16.xpose.msra.mxu0 %v1796_v23  ;;  %v1948_v23 = vor.u32 %v2142_v14, %v1947_v13  ;;  %v1928_v13 = vor.u32 %v2135_v6, %v1925_v7 }
  0xb1   :  { %999 = vmatpush.bf16.xpose.msra.mxu1 %v1800_v24  ;;  %v1952_v24 = vor.u32 %v2141_v15, %v1949_v17 }
  0xb2   :  { %1017 = vmatpush.bf16.xpose.msra.mxu2 %v1860_v25  ;;  %1035 = vmatpush.bf16.xpose.msra.mxu3 %v1864_v26  ;;  %v2012_v25 = vor.u32 %v2158_v19, %v2011_v18  ;;  %v2016_v26 = vor.u32 %v2157_v21, %v2013_v22 }
  0xb8   :  { %982 = vmatpush.bf16.xpose.msra.mxu0 %v1788_v35  ;;  %v2156_v35 = vld [vmem:[#allocation5 + $0x3c4] sm:$0xf0] }
  0xb9   :  { %1000 = vmatpush.bf16.xpose.msra.mxu1 %v1792_v36  ;;  %v2155_v36 = vld [vmem:[#allocation5 + $0x3c4] sm:$0xf]  ;;  %v2004_v40 = vor.u32 %v2156_v35, %v2003_v34 }
  0xba   :  { %1018 = vmatpush.bf16.xpose.msra.mxu2 %v1852_v37  ;;  %1036 = vmatpush.bf16.xpose.msra.mxu3 %v1856_v38  ;;  %v2005_v37 = vld [vmem:[#allocation5 + $0x3c8] sm:$0xf0]  ;;  %v1940_v38 = vor.u32 %v2140_v31, %v1939_v30  ;;  %v2149_v30 = vld [vmem:[#allocation5 + $0x394] sm:$0xf]  ;;  %v1981_v31 = vld [vmem:[#allocation5 + $0x398] sm:$0xf0] }
  0xbb   :  { %v2008_v42 = vor.u32 %v2155_v36, %v2005_v37  ;;  %v1984_v36 = vor.u32 %v2149_v30, %v1981_v31 }
  0xc0   :  { %983 = vmatpush.bf16.xpose.msra.mxu0 %v1780_v50  ;;  %v2137_v50 = vld [vmem:[#allocation5 + $0x334] sm:$0xf] }
  0xc1   :  { %1001 = vmatpush.bf16.xpose.msra.mxu1 %v1784_v56  ;;  %v2153_v56 = vld [vmem:[#allocation5 + $0x3b4] sm:$0xf]  ;;  %v1936_v59 = vor.u32 %v2137_v50, %v1933_v52 }
  0xc2   :  { %1019 = vmatpush.bf16.xpose.msra.mxu2 %v1844_v57  ;;  %1037 = vmatpush.bf16.xpose.msra.mxu3 %v1848_v60  ;;  %v1997_v57 = vld [vmem:[#allocation5 + $0x3b8] sm:$0xf0]  ;;  %v1996_v60 = vor.u32 %v2154_v54, %v1995_v53 }
  0xc4   :  { %v841_v27 = vpop.f32.mrf.mxu0 }
  0xc5   :  { %v859_v28 = vpop.f32.mrf.mxu1 }
  0xc6   :  { %v2336_v29 = vadd.f32 %v859_v28, %v841_v27  ;;  %v1979_v27 = vld [vmem:[#allocation5 + $0x390] sm:$0xf]  ;;  %v2150_v28 = vld [vmem:[#allocation5 + $0x394] sm:$0xf0] }
  0xc7   :  { %984 = vmatmul.bf16.vlgmr.msra.gmra.mxu0 %v2305_v51  ;;  %v1980_v34 = vor.u32 %v2150_v28, %v1979_v27 }
  0xc8   :  { %1048 = vmatpush.bf16.xpose.msrb.mxu0 %v1964_v61  ;;  %1002 = vmatmul.bf16.vlgmr.msra.gmra.mxu1 %v2307_v55 }
  0xc9   :  { %1066 = vmatpush.bf16.xpose.msrb.mxu1 %v1968_v62  ;;  %1020 = vmatmul.bf16.vlgmr.msra.gmra.mxu2 %v2305_v51  ;;  %v2000_v62 = vor.u32 %v2153_v56, %v1997_v57 }
  0xca   :  { %1084 = vmatpush.bf16.xpose.msrb.mxu2 %v2028_v63  ;;  %1102 = vmatpush.bf16.xpose.msrb.mxu3 %v2032_v0 }
  0xcb   :  { %1038 = vmatmul.bf16.vlgmr.msra.gmra.mxu3 %v2307_v55 }
  0xcc   :  { %v877_v41 = vpop.f32.mrf.mxu2  ;;  %v843_v44 = vpop.f32.mrf.mxu0 }
  0xcd   :  { %v861_v46 = vpop.f32.mrf.mxu1 }
  0xce   :  { %v895_v43 = vpop.f32.mrf.mxu3  ;;  %v2344_v47 = vadd.f32 %v861_v46, %v843_v44  ;;  %v2147_v44 = vld [vmem:[#allocation5 + $0x384] sm:$0xf]  ;;  %v1973_v46 = vld [vmem:[#allocation5 + $0x388] sm:$0xf0] }
  0xcf   :  { %v2342_v45 = vadd.f32 %v895_v43, %v877_v41  ;;  %v1909_v41 = vld [vmem:[#allocation5 + $0x308] sm:$0xf0]  ;;  %v2148_v43 = vld [vmem:[#allocation5 + $0x384] sm:$0xf0]  ;;  %v1976_v52 = vor.u32 %v2147_v44, %v1973_v46 }
  0xd0   :  { %1049 = vmatpush.bf16.xpose.msrb.mxu0 %v1956_v9  ;;  %v2152_v9 = vld [vmem:[#allocation5 + $0x3a4] sm:$0xf0] }
  0xd1   :  { %1067 = vmatpush.bf16.xpose.msrb.mxu1 %v1960_v10  ;;  %v2151_v10 = vld [vmem:[#allocation5 + $0x3a4] sm:$0xf]  ;;  %v1988_v14 = vor.u32 %v2152_v9, %v1987_v8 }
  0xd2   :  { %1085 = vmatpush.bf16.xpose.msrb.mxu2 %v2020_v11  ;;  %1103 = vmatpush.bf16.xpose.msrb.mxu3 %v2024_v12  ;;  %v1989_v11 = vld [vmem:[#allocation5 + $0x3a8] sm:$0xf0]  ;;  %v1924_v12 = vor.u32 %v2136_v5, %v1923_v4 }
  0xd3   :  { %v1992_v17 = vor.u32 %v2151_v10, %v1989_v11 }
  0xd4   :  { %v879_v61 = vpop.f32.mrf.mxu2  ;;  %v846_v0 = vpop.f32.mrf.mxu0 }
  0xd5   :  { %v864_v2 = vpop.f32.mrf.mxu1 }
  0xd6   :  { %v897_v63 = vpop.f32.mrf.mxu3  ;;  %v2348_v3 = vadd.f32 %v864_v2, %v846_v0 }
  0xd7   :  { %989 = vmatmul.bf16.gmra.mxu0 %v2316_v16  ;;  %v2346_v1 = vadd.f32 %v897_v63, %v879_v61 }
  0xd8   :  { %1050 = vmatpush.bf16.xpose.msrb.mxu0 %v1948_v23  ;;  %1007 = vmatmul.bf16.gmra.mxu1 %v2318_v20  ;;  %v1915_v23 = vld [vmem:[#allocation5 + $0x310] sm:$0xf] }
  0xd9   :  { %1068 = vmatpush.bf16.xpose.msrb.mxu1 %v1952_v24  ;;  %1025 = vmatmul.bf16.gmra.mxu2 %v2316_v16  ;;  %v2134_v24 = vld [vmem:[#allocation5 + $0x314] sm:$0xf0] }
  0xda   :  { %1086 = vmatpush.bf16.xpose.msrb.mxu2 %v2012_v25  ;;  %1104 = vmatpush.bf16.xpose.msrb.mxu3 %v2016_v26  ;;  %v2133_v25 = vld [vmem:[#allocation5 + $0x314] sm:$0xf]  ;;  %v1917_v26 = vld [vmem:[#allocation5 + $0x318] sm:$0xf0]  ;;  %v1916_v32 = vor.u32 %v2134_v24, %v1915_v23 }
  0xdb   :  { %1043 = vmatmul.bf16.gmra.mxu3 %v2318_v20  ;;  %v1920_v33 = vor.u32 %v2133_v25, %v1917_v26 }
  0xdc   :  { %v882_v15 = vpop.f32.mrf.mxu2  ;;  %v848_v19 = vpop.f32.mrf.mxu0 }
  0xdd   :  { %v866_v22 = vpop.f32.mrf.mxu1 }
  0xde   :  { %v900_v18 = vpop.f32.mrf.mxu3 }
  0xdf   :  { %v2350_v21 = vadd.f32 %v900_v18, %v882_v15 }
  0xe0   :  { %1051 = vmatpush.bf16.xpose.msrb.mxu0 %v1940_v38  ;;  %v1907_v38 = vld [vmem:[#allocation5 + $0x300] sm:$0xf] }
  0xe1   :  { %1069 = vmatpush.bf16.xpose.msrb.mxu1 %v1944_v39  ;;  %v2132_v39 = vld [vmem:[#allocation5 + $0x304] sm:$0xf0] }
  0xe2   :  { %1087 = vmatpush.bf16.xpose.msrb.mxu2 %v2004_v40  ;;  %1105 = vmatpush.bf16.xpose.msrb.mxu3 %v2008_v42  ;;  %v2131_v40 = vld [vmem:[#allocation5 + $0x304] sm:$0xf]  ;;  %v1971_v42 = vld [vmem:[#allocation5 + $0x380] sm:$0xf]  ;;  %v1908_v48 = vor.u32 %v2132_v39, %v1907_v38 }
  0xe3   :  { %v1912_v49 = vor.u32 %v2131_v40, %v1909_v41  ;;  %v1972_v50 = vor.u32 %v2148_v43, %v1971_v42 }
  0xe4   :  { %v884_v35 = vpop.f32.mrf.mxu2 }
  0xe6   :  { %v902_v37 = vpop.f32.mrf.mxu3 }
  0xe7   :  { %v2267_v37 = vmov -1e+30  }
  0xe8   :  { %1052 = vmatpush.bf16.xpose.msrb.mxu0 %v1932_v58  ;;  %35 = vst.msk [vmem:[#allocation2] sm:$0xff] %vm34_vm0, %v2267_v37 }
  0xe9   :  { %1070 = vmatpush.bf16.xpose.msrb.mxu1 %v1936_v59  ;;  %36 = vst.msk [vmem:[#allocation2 + $0x8] sm:$0xff] %vm34_vm0, %v2267_v37 }
  0xea   :  { %1088 = vmatpush.bf16.xpose.msrb.mxu2 %v1996_v60  ;;  %1106 = vmatpush.bf16.xpose.msrb.mxu3 %v2000_v62  ;;  %37 = vst.msk [vmem:[#allocation2 + $0x10] sm:$0xff] %vm34_vm0, %v2267_v37 }
  0xf0   :  { %1053 = vmatpush.bf16.xpose.msrb.mxu0 %v1924_v12 }
  0xf1   :  { %1071 = vmatpush.bf16.xpose.msrb.mxu1 %v1928_v13 }
  0xf2   :  { %1089 = vmatpush.bf16.xpose.msrb.mxu2 %v1988_v14  ;;  %1107 = vmatpush.bf16.xpose.msrb.mxu3 %v1992_v17 }
  0xf8   :  { %1054 = vmatpush.bf16.xpose.msrb.mxu0 %v1916_v32 }
  0xf9   :  { %1072 = vmatpush.bf16.xpose.msrb.mxu1 %v1920_v33  ;;  %v1120_v33 = vlaneseq }
  0xfa   :  { %1090 = vmatpush.bf16.xpose.msrb.mxu2 %v1980_v34  ;;  %1108 = vmatpush.bf16.xpose.msrb.mxu3 %v1984_v36 }
  0xfb   :  { %v2378_v35 = vand.u32 127, %v1120_v33 }
  0xfd   :  { %v2384_v38 = vadd.s32 896, %v2378_v35 }
  0xff   :  { %vm1146_vm1 = vcmp.lt.s32.totalorder %v2384_v38, 1000 }
 0x100   :  { %1055 = vmatpush.bf16.xpose.msrb.mxu0 %v1908_v48 }
 0x101   :  { %1073 = vmatpush.bf16.xpose.msrb.mxu1 %v1912_v49 }
 0x102   :  { %1091 = vmatpush.bf16.xpose.msrb.mxu2 %v1972_v50  ;;  %1109 = vmatpush.bf16.xpose.msrb.mxu3 %v1976_v52 }
 0x104   :  { %v913_v53 = vpop.f32.mrf.mxu0 }
 0x105   :  { %v931_v54 = vpop.f32.mrf.mxu1 }
 0x106   :  { %v2356_v56 = vadd.f32 %v931_v54, %v913_v53 }
 0x107   :  { %1056 = vmatmul.bf16.vlgmr.msrb.gmra.mxu0 %v2305_v51 }
 0x108   :  { %1074 = vmatmul.bf16.vlgmr.msrb.gmra.mxu1 %v2307_v55  ;;  %v1174_v41 = vmax.f32 %v2336_v29, %v2356_v56 }
 0x109   :  { %1092 = vmatmul.bf16.vlgmr.msrb.gmra.mxu2 %v2305_v51  ;;  %1110 = vmatmul.bf16.vlgmr.msrb.gmra.mxu3 %v2307_v55 }
 0x10c   :  { %v949_v57 = vpop.f32.mrf.mxu2  ;;  %v915_v59 = vpop.f32.mrf.mxu0 }
 0x10d   :  { %v933_v51 = vpop.f32.mrf.mxu1 }
 0x10e   :  { %v967_v58 = vpop.f32.mrf.mxu3  ;;  %v2364_v61 = vadd.f32 %v933_v51, %v915_v59 }
 0x10f   :  { %v2362_v60 = vadd.f32 %v967_v58, %v949_v57 }
 0x111   :  { %v1175_v42 = vmax.f32 %v2342_v45, %v2362_v60 }
 0x114   :  { %v951_v55 = vpop.f32.mrf.mxu2  ;;  %v918_v63 = vpop.f32.mrf.mxu0 }
 0x115   :  { %v936_v2 = vpop.f32.mrf.mxu1 }
 0x116   :  { %v969_v62 = vpop.f32.mrf.mxu3  ;;  %v2368_v4 = vadd.f32 %v936_v2, %v918_v63 }
 0x117   :  { %1061 = vmatmul.bf16.gmra.mxu0 %v2316_v16  ;;  %v2366_v0 = vadd.f32 %v969_v62, %v951_v55  ;;  %v1183_v55 = vmax.f32 %v2344_v47, %v2364_v61 }
 0x118   :  { %1079 = vmatmul.bf16.gmra.mxu1 %v2318_v20 }
 0x119   :  { %1097 = vmatmul.bf16.gmra.mxu2 %v2316_v16  ;;  %1115 = vmatmul.bf16.gmra.mxu3 %v2318_v20  ;;  %v1184_v62 = vmax.f32 %v2346_v1, %v2366_v0 }
 0x11c   :  { %v954_v5 = vpop.f32.mrf.mxu2  ;;  %v920_v16 = vpop.f32.mrf.mxu0 }
 0x11d   :  { %v938_v8 = vpop.f32.mrf.mxu1 }
 0x11e   :  { %v972_v6 = vpop.f32.mrf.mxu3 }
 0x11f   :  { %v2370_v7 = vadd.f32 %v972_v6, %v954_v5 }
 0x124   :  { %v956_v20 = vpop.f32.mrf.mxu2 }
 0x126   :  { %v974_v9 = vpop.f32.mrf.mxu3 }
 0x144   :  { %v985_v10 = vpop.f32.mrf.mxu0 }
 0x145   :  { %v1003_v11 = vpop.f32.mrf.mxu1 }
 0x146   :  { %v2372_v12 = vadd.f32 %v1003_v11, %v985_v10 }
 0x148   :  { %v1176_v50 = vmax.f32 %v1174_v41, %v2372_v12  ;;  %v1300_v41 = vld [vmem:[%s2696_s0] sm:$0xff] }
 0x14c   :  { %v1021_v13 = vpop.f32.mrf.mxu2  ;;  %v987_v15 = vpop.f32.mrf.mxu0 }
 0x14d   :  { %v1005_v17 = vpop.f32.mrf.mxu1 }
 0x14e   :  { %v1039_v14 = vpop.f32.mrf.mxu3  ;;  %v2374_v18 = vadd.f32 %v1005_v17, %v987_v15  ;;  %v1193_v17 = vmax.f32 %v2350_v21, %v2370_v7 }
 0x14f   :  { %v2386_v39 = vadd.f32 %v1039_v14, %v1021_v13 }
 0x150   :  { %v1185_v8 = vmax.f32 %v1183_v55, %v2374_v18 }
 0x151   :  { %v1177_v52 = vmax.f32 %v1175_v42, %v2386_v39  ;;  %v2269_v42 = vmov 0.0  }
 0x152   :  { %39 = vst.msk [vmem:[#allocation3 + $0x8] sm:$0xff] %vm34_vm0, %v2269_v42 }
 0x153   :  { %38 = vst.msk [vmem:[#allocation3] sm:$0xff] %vm34_vm0, %v2269_v42 }
 0x154   :  { %v1023_v19 = vpop.f32.mrf.mxu2  ;;  %v990_v23 = vpop.f32.mrf.mxu0  ;;  %40 = vst.msk [vmem:[#allocation3 + $0x10] sm:$0xff] %vm34_vm0, %v2269_v42 }
 0x155   :  { %v1008_v24 = vpop.f32.mrf.mxu1  ;;  %41 = vst.msk [vmem:[#allocation4] sm:$0xff] %vm34_vm0, %v2269_v42 }
 0x156   :  { %v1041_v22 = vpop.f32.mrf.mxu3  ;;  %v2376_v25 = vadd.f32 %v1008_v24, %v990_v23  ;;  %42 = vst.msk [vmem:[#allocation4 + $0x8] sm:$0xff] %vm34_vm0, %v2269_v42 }
 0x157   :  { %v2403_v58 = vadd.f32 %v1041_v22, %v1023_v19  ;;  %v1192_v19 = vmax.f32 %v2348_v3, %v2368_v4  ;;  %43 = vst.msk [vmem:[#allocation4 + $0x10] sm:$0xff] %vm34_vm0, %v2269_v42 }
 0x159   :  { %v1186_v20 = vmax.f32 %v1184_v62, %v2403_v58 }
 0x15c   :  { %v1026_v26 = vpop.f32.mrf.mxu2  ;;  %v992_v28 = vpop.f32.mrf.mxu0 }
 0x15d   :  { %v1010_v30 = vpop.f32.mrf.mxu1 }
 0x15e   :  { %v1044_v27 = vpop.f32.mrf.mxu3 }
 0x15f   :  { %v2419_v13 = vadd.f32 %v1044_v27, %v1026_v26 }
 0x161   :  { %v1195_v26 = vmax.f32 %v1193_v17, %v2419_v13 }
 0x164   :  { %v1028_v31 = vpop.f32.mrf.mxu2 }
 0x165   :  { %v1194_v31 = vmax.f32 %v1192_v19, %v2376_v25 }
 0x166   :  { %v1046_v32 = vpop.f32.mrf.mxu3 }
 0x184   :  { %v1057_v34 = vpop.f32.mrf.mxu0 }
 0x185   :  { %v1075_v36 = vpop.f32.mrf.mxu1 }
 0x186   :  { %v2392_v43 = vadd.f32 %v1075_v36, %v1057_v34 }
 0x188   :  { %v1178_v54 = vmax.f32 %v1176_v50, %v2392_v43  ;;  %v2454_v50 = vld [vmem:[#allocation2 + $0x8] sm:$0xff] }
 0x18c   :  { %v1093_v40 = vpop.f32.mrf.mxu2  ;;  %v1111_v44 = vpop.f32.mrf.mxu3 }
 0x18d   :  { %v1059_v46 = vpop.f32.mrf.mxu0  ;;  %v1112_v48 = vadd.f32 %v1111_v44, %v1093_v40  ;;  %v1077_v49 = vpop.f32.mrf.mxu1  ;;  %v2268_v40 = vmov 0   ;;  %v2444_v44 = vld [vmem:[#allocation2] sm:$0xff] }
 0x18e   :  { %v2409_v63 = vadd.f32 %v1077_v49, %v1059_v46  ;;  %2169 = vset.pattern.permute.xlu1 %v2268_v40  ;;  %2170 = vset.pattern.permute.xlu2 %v2268_v40 }
 0x18f   :  { %v2399_v53 = vsel %vm1146_vm1, %v1112_v48, -1e+30  ;;  %2171 = vset.pattern.permute.xlu0 %v2268_v40 }
 0x190   :  { %v1179_v57 = vmax.f32 %v1177_v52, %v2399_v53  ;;  %v1187_v10 = vmax.f32 %v1185_v8, %v2409_v63 }
 0x192   :  { %v1180_v59 = vmax.f32 %v1178_v54, %v1179_v57 }
 0x194   :  { %v1095_v51 = vpop.f32.mrf.mxu2  ;;  %v1113_v2 = vpop.f32.mrf.mxu3  ;;  %1181 = vmax.xlane.f32.xlu0 %v1180_v59  ;;  %v2464_v59 = vld [vmem:[#allocation2 + $0x10] sm:$0xff] }
 0x195   :  { %v1062_v5 = vpop.f32.mrf.mxu0  ;;  %v1114_v6 = vadd.f32 %v1113_v2, %v1095_v51  ;;  %v1080_v16 = vpop.f32.mrf.mxu1  ;;  %v1301_v2 = vld [vmem:[%s2696_s0 + $0x8] sm:$0xff] }
 0x196   :  { %v2425_v22 = vadd.f32 %v1080_v16, %v1062_v5  ;;  %v1302_v5 = vld [vmem:[%s2696_s0 + $0x10] sm:$0xff] }
 0x197   :  { %v2415_v9 = vsel %vm1146_vm1, %v1114_v6, -1e+30 }
 0x198   :  { %v1188_v11 = vmax.f32 %v1186_v20, %v2415_v9  ;;  %v1196_v32 = vmax.f32 %v1194_v31, %v2425_v22 }
 0x19a   :  { %v1189_v14 = vmax.f32 %v1187_v10, %v1188_v11 }
 0x19c   :  { %v1098_v15 = vpop.f32.mrf.mxu2  ;;  %v1116_v23 = vpop.f32.mrf.mxu3  ;;  %1190 = vmax.xlane.f32.xlu0 %v1189_v14 }
 0x19d   :  { %v1064_v24 = vpop.f32.mrf.mxu0  ;;  %v1117_v28 = vadd.f32 %v1116_v23, %v1098_v15  ;;  %v1082_v30 = vpop.f32.mrf.mxu1 }
 0x19f   :  { %v2431_v27 = vsel %vm1146_vm1, %v1117_v28, -1e+30 }
 0x1a0   :  { %v1197_v33 = vmax.f32 %v1195_v26, %v2431_v27 }
 0x1a2   :  { %v1198_v34 = vmax.f32 %v1196_v32, %v1197_v33 }
 0x1a4   :  { %v1100_v36 = vpop.f32.mrf.mxu2  ;;  %v1118_v37 = vpop.f32.mrf.mxu3  ;;  %1199 = vmax.xlane.f32.xlu1 %v1198_v34 }
 0x1b0   :  { %1304 = vperm.xlu0 %2171, %v1300_v41   ;;  %v2496_v41 = vadd.s32 128, %v2378_v35 }
 0x207   :  { %v1182_v46 = vpop.xlane.xlu0 %1181 }
 0x208   :  { %v2447_v48 = vmax.f32 %v2444_v44, %v1182_v46 }
 0x20a   :  { %v1204_v49 = vsub.f32 %v2444_v44, %v2447_v48  ;;  %1439 = vst.msk [vmem:[#allocation2] sm:$0xff] %vm34_vm0, %v2447_v48  ;;  %1215 = vperm.xlu1 %2169, %v2447_v48  }
 0x20f   :  { %v1191_v52 = vpop.xlane.xlu0 %1190 }
 0x210   :  { %v2457_v54 = vmax.f32 %v2454_v50, %v1191_v52 }
 0x212   :  { %v1205_v57 = vsub.f32 %v2454_v50, %v2457_v54  ;;  %1440 = vst.msk [vmem:[#allocation2 + $0x8] sm:$0xff] %vm34_vm0, %v2457_v54  ;;  %1220 = vperm.xlu2 %2170, %v2457_v54   ;;  %v1207_v50 = vmul.f32 1.442695, %v1204_v49 }
 0x217   :  { %v1200_v51 = vpop.xlane.xlu1 %1199 }
 0x218   :  { %v2467_v55 = vmax.f32 %v2464_v59, %v1200_v51  ;;  %v2504_v51 = vadd.s32 256, %v2378_v35 }
 0x21a   :  { %v1206_v62 = vsub.f32 %v2464_v59, %v2467_v55  ;;  %1441 = vst.msk [vmem:[#allocation2 + $0x10] sm:$0xff] %vm34_vm0, %v2467_v55  ;;  %1225 = vperm.xlu2 %2170, %v2467_v55  }
 0x222   :  { %1307 = vperm.xlu2 %2170, %v1301_v2  }
 0x22a   :  { %1310 = vperm.xlu2 %2170, %v1302_v5  }
 0x26c   :  { %v1221_v6 = vpop.permute.xlu2 %1220 }
 0x26d   :  { %v1236_v16 = vsub.f32 %v2344_v47, %v1221_v6  ;;  %v1237_v8 = vsub.f32 %v2346_v1, %v1221_v6  ;;  %v1238_v20 = vsub.f32 %v2364_v61, %v1221_v6  ;;  %v1239_v10 = vsub.f32 %v2366_v0, %v1221_v6 }
 0x26e   :  { %v1240_v15 = vsub.f32 %v2374_v18, %v1221_v6  ;;  %v1241_v17 = vsub.f32 %v2403_v58, %v1221_v6  ;;  %v1242_v24 = vsub.f32 %v2409_v63, %v1221_v6  ;;  %v1243_v30 = vsub.f32 %v2415_v9, %v1221_v6 }
 0x26f   :  { %v1268_v11 = vmul.f32 1.442695, %v1236_v16  ;;  %v1270_v14 = vmul.f32 1.442695, %v1237_v8  ;;  %v1272_v19 = vmul.f32 1.442695, %v1238_v20 }
 0x270   :  { %v1274_v23 = vmul.f32 1.442695, %v1239_v10  ;;  %v1276_v28 = vmul.f32 1.442695, %v1240_v15  ;;  %v1278_v1 = vmul.f32 1.442695, %v1241_v17 }
 0x271   :  { %2172 = vpow2.f32 %v1268_v11  ;;  %v1280_v63 = vmul.f32 1.442695, %v1242_v24  ;;  %v2509_v6 = vadd.s32 384, %v2378_v35  ;;  %v2518_v20 = vadd.s32 512, %v2378_v35 }
 0x272   :  { %2174 = vpow2.f32 %v1270_v14  ;;  %v2532_v17 = vadd.s32 640, %v2378_v35 }
 0x273   :  { %2176 = vpow2.f32 %v1272_v19  ;;  %v2535_v19 = vadd.s32 768, %v2378_v35 }
 0x274   :  { %v1226_v47 = vpop.permute.xlu2 %1225  ;;  %2178 = vpow2.f32 %v1274_v23 }
 0x275   :  { %v1244_v61 = vsub.f32 %v2348_v3, %v1226_v47  ;;  %v1245_v0 = vsub.f32 %v2350_v21, %v1226_v47  ;;  %v1246_v18 = vsub.f32 %v2368_v4, %v1226_v47  ;;  %v1247_v58 = vsub.f32 %v2370_v7, %v1226_v47 }
 0x276   :  { %2180 = vpow2.f32 %v1276_v28  ;;  %v1248_v34 = vsub.f32 %v2376_v25, %v1226_v47  ;;  %v1282_v3 = vmul.f32 1.442695, %v1243_v30  ;;  %v1249_v21 = vsub.f32 %v2419_v13, %v1226_v47 }
 0x277   :  { %v2173_v31 = vpop.eup %2172  ;;  %v1284_v26 = vmul.f32 1.442695, %v1244_v61  ;;  %v1286_v32 = vmul.f32 1.442695, %v1245_v0  ;;  %2182 = vpow2.f32 %v1278_v1  ;;  %v1288_v36 = vmul.f32 1.442695, %v1246_v18 }
 0x278   :  { %v2175_v33 = vpop.eup %2174  ;;  %v1290_v4 = vmul.f32 1.442695, %v1247_v58  ;;  %v1250_v40 = vsub.f32 %v2425_v22, %v1226_v47  ;;  %v1251_v52 = vsub.f32 %v2431_v27, %v1226_v47  ;;  %v1292_v13 = vmul.f32 1.442695, %v1248_v34 }
 0x279   :  { %v1415_v37 = vadd.f32 %v2175_v33, %v2173_v31  ;;  %2184 = vpow2.f32 %v1284_v26  ;;  %v2177_v9 = vpop.eup %2176  ;;  %v1294_v22 = vmul.f32 1.442695, %v1249_v21 }
 0x27a   :  { %2186 = vpow2.f32 %v1286_v32  ;;  %v2179_v42 = vpop.eup %2178  ;;  %v1296_v14 = vmul.f32 1.442695, %v1250_v40 }
 0x27b   :  { %2188 = vpow2.f32 %v1280_v63  ;;  %v1416_v7 = vadd.f32 %v2177_v9, %v1415_v37 }
 0x27c   :  { %v2498_v46 = vpop.permute.xlu2 %1307  ;;  %v2500_v25 = vpop.permute.xlu1 %1215  ;;  %2190 = vpow2.f32 %v1288_v36 }
 0x27d   :  { %v2506_v2 = vpop.eup %2180  ;;  %2192 = vpow2.f32 %v1282_v3  ;;  %v1417_v5 = vadd.f32 %v2179_v42, %v1416_v7  ;;  %v1228_v8 = vsub.f32 %v2336_v29, %v2500_v25  ;;  %v1229_v27 = vsub.f32 %v2342_v45, %v2500_v25  ;;  %v2529_v29 = vpop.permute.xlu0 %1304 }
 0x27e   :  { %v2511_v16 = vpop.eup %2182  ;;  %2194 = vpow2.f32 %v1290_v4  ;;  %vm1320_vm2 = vcmp.eq.s32.totalorder %v2378_v35, %v2498_v46  ;;  %vm1321_vm3 = vcmp.eq.s32.totalorder %v2496_v41, %v2498_v46  ;;  %v1298_v45 = vmul.f32 1.442695, %v1251_v52 }
 0x27f   :  { %v2520_v10 = vpop.eup %2184  ;;  %v1418_v11 = vadd.f32 %v2506_v2, %v1417_v5  ;;  %2196 = vpow2.f32 %v1292_v13  ;;  %vm1322_vm4 = vcmp.eq.s32.totalorder %v2504_v51, %v2498_v46  ;;  %v1252_v1 = vmul.f32 1.442695, %v1228_v8 }
 0x280   :  { %v2527_v15 = vpop.eup %2186  ;;  %2198 = vpow2.f32 %v1294_v22  ;;  %v1254_v61 = vmul.f32 1.442695, %v1229_v27  ;;  %v1350_v0 = vsel %vm1320_vm2, %v2173_v31, 0.0  ;;  %v1351_v30 = vsel %vm1321_vm3, %v2175_v33, 0.0 }
 0x281   :  { %v2189_v23 = vpop.eup %2188  ;;  %v1419_v24 = vadd.f32 %v2511_v16, %v1418_v11  ;;  %v1424_v28 = vadd.f32 %v2527_v15, %v2520_v10  ;;  %2200 = vpow2.f32 %v1296_v14  ;;  %vm1323_vm5 = vcmp.eq.s32.totalorder %v2509_v6, %v2498_v46 }
 0x282   :  { %v2542_v47 = vpop.eup %2190  ;;  %vm1312_vm6 = vcmp.eq.s32.totalorder %v2378_v35, %v2529_v29  ;;  %2202 = vpow2.f32 %v1298_v45  ;;  %v1352_v63 = vsel %vm1322_vm4, %v2177_v9, 0.0  ;;  %v1375_v31 = vadd.f32 %v1351_v30, %v1350_v0 }
 0x283   :  { %v2193_v18 = vpop.eup %2192  ;;  %v1420_v58 = vadd.f32 %v2189_v23, %v1419_v24  ;;  %v1425_v26 = vadd.f32 %v2542_v47, %v1424_v28  ;;  %v1230_v34 = vsub.f32 %v2356_v56, %v2500_v25  ;;  %vm1313_vm7 = vcmp.eq.s32.totalorder %v2496_v41, %v2529_v29 }
 0x284   :  { %v2555_v32 = vpop.eup %2194  ;;  %v1231_v3 = vsub.f32 %v2362_v60, %v2500_v25  ;;  %v1232_v37 = vsub.f32 %v2372_v12, %v2500_v25  ;;  %vm1324_vm8 = vcmp.eq.s32.totalorder %v2518_v20, %v2498_v46  ;;  %v1353_v9 = vsel %vm1323_vm5, %v2179_v42, 0.0  ;;  %v2588_v8 = vpop.permute.xlu2 %1310 }
 0x285   :  { %v1421_v33 = vadd.f32 %v2193_v18, %v1420_v58  ;;  %v1426_v36 = vadd.f32 %v2555_v32, %v1425_v26  ;;  %v2566_v21 = vpop.eup %2196  ;;  %v1376_v4 = vadd.f32 %v1375_v31, %v1352_v63  ;;  %v1233_v56 = vsub.f32 %v2386_v39, %v2500_v25 }
 0x286   :  { %v2572_v7 = vpop.eup %2198  ;;  %2204 = vpow2.f32 %v1252_v1  ;;  %v1256_v60 = vmul.f32 1.442695, %v1230_v34  ;;  %v1258_v52 = vmul.f32 1.442695, %v1231_v3  ;;  %vm1325_vm9 = vcmp.eq.s32.totalorder %v2532_v17, %v2498_v46 }
 0x287   :  { %1422 = vadd.xlane.f32.xlu1 %v1421_v33  ;;  %v1427_v40 = vadd.f32 %v2566_v21, %v1426_v36  ;;  %vm1326_vm10 = vcmp.eq.s32.totalorder %v2535_v19, %v2498_v46  ;;  %v1377_v12 = vadd.f32 %v1376_v4, %v1353_v9  ;;  %2206 = vpow2.f32 %v1254_v61  ;;  %v2579_v42 = vpop.eup %2200 }
 0x288   :  { %v1354_v13 = vsel %vm1324_vm8, %v2506_v2, 0.0  ;;  %2208 = vpow2.f32 %v1256_v60  ;;  %v1260_v5 = vmul.f32 1.442695, %v1232_v37  ;;  %v2586_v22 = vpop.eup %2202  ;;  %vm1327_vm11 = vcmp.eq.s32.totalorder %v2384_v38, %v2498_v46 }
 0x289   :  { %v1428_v39 = vadd.f32 %v2572_v7, %v1427_v40  ;;  %v1378_v27 = vadd.f32 %v1377_v12, %v1354_v13  ;;  %v1234_v11 = vsub.f32 %v2392_v43, %v2500_v25  ;;  %2210 = vpow2.f32 %v1258_v52 }
 0x28a   :  { %v1355_v2 = vsel %vm1325_vm9, %v2511_v16, 0.0  ;;  %v1235_v45 = vsub.f32 %v2399_v53, %v2500_v25  ;;  %v1262_v24 = vmul.f32 1.442695, %v1233_v56  ;;  %v1356_v28 = vsel %vm1326_vm10, %v2189_v23, 0.0 }
 0x28b   :  { %v1429_v14 = vadd.f32 %v2579_v42, %v1428_v39  ;;  %v1379_v1 = vadd.f32 %v1378_v27, %v1355_v2  ;;  %vm1314_vm12 = vcmp.eq.s32.totalorder %v2504_v51, %v2529_v29  ;;  %vm1315_vm13 = vcmp.eq.s32.totalorder %v2509_v6, %v2529_v29 }
 0x28c   :  { %v2205_v43 = vpop.eup %2204  ;;  %2212 = vpow2.f32 %v1260_v5  ;;  %vm1328_vm14 = vcmp.eq.s32.totalorder %v2378_v35, %v2588_v8  ;;  %vm1329_vm15 = vcmp.eq.s32.totalorder %v2496_v41, %v2588_v8  ;;  %v1357_v25 = vsel %vm1327_vm11, %v2193_v18, 0.0 }
 0x28d   :  { %v1430_v61 = vadd.f32 %v2586_v22, %v1429_v14  ;;  %v2207_v53 = vpop.eup %2206  ;;  %v1380_v16 = vadd.f32 %v1379_v1, %v1356_v28  ;;  %v1264_v23 = vmul.f32 1.442695, %v1234_v11  ;;  %v1342_v0 = vsel %vm1312_vm6, %v2205_v43, 0.0 }
 0x28e   :  { %v2209_v30 = vpop.eup %2208  ;;  %2214 = vpow2.f32 %v1262_v24  ;;  %v1266_v58 = vmul.f32 1.442695, %v1235_v45  ;;  %v1406_v26 = vadd.f32 %v2207_v53, %v2205_v43  ;;  %v1343_v63 = vsel %vm1313_vm7, %v2207_v53, 0.0 }
 0x28f   :  { %1431 = vadd.xlane.f32.xlu0 %v1430_v61  ;;  %v2211_v31 = vpop.eup %2210  ;;  %v1381_v34 = vadd.f32 %v1380_v16, %v1357_v25  ;;  %v1366_v33 = vadd.f32 %v1343_v63, %v1342_v0  ;;  %v1358_v46 = vsel %vm1328_vm14, %v2520_v10, 0.0  ;;  %v1359_v18 = vsel %vm1329_vm15, %v2527_v15, 0.0  ;;  %v1401_v25 = vld [vmem:[#allocation3 + $0x8] sm:$0xff]  ;;  %v1337_v0 = vld [vmem:[#allocation4 + $0x8] sm:$0xff] }
 0x290   :  { %v1407_v36 = vadd.f32 %v2209_v30, %v1406_v26  ;;  %v1344_v3 = vsel %vm1314_vm12, %v2209_v30, 0.0  ;;  %2216 = vpow2.f32 %v1264_v23  ;;  %vm1316_vm1 = vcmp.eq.s32.totalorder %v2518_v20, %v2529_v29 }
 0x291   :  { %1382 = vadd.xlane.f32.xlu1 %v1381_v34  ;;  %v1367_v37 = vadd.f32 %v1366_v33, %v1344_v3  ;;  %v1345_v35 = vsel %vm1315_vm13, %v2211_v31, 0.0  ;;  %vm1330_vm2 = vcmp.eq.s32.totalorder %v2504_v51, %v2588_v8  ;;  %v1384_v41 = vadd.f32 %v1359_v18, %v1358_v46  ;;  %v1400_v34 = vld [vmem:[#allocation3] sm:$0xff] }
 0x292   :  { %v2213_v9 = vpop.eup %2212  ;;  %v1408_v4 = vadd.f32 %v2211_v31, %v1407_v36  ;;  %2218 = vpow2.f32 %v1266_v58  ;;  %vm1317_vm3 = vcmp.eq.s32.totalorder %v2532_v17, %v2529_v29  ;;  %v1360_v60 = vsel %vm1330_vm2, %v2542_v47, 0.0 }
 0x293   :  { %v1368_v10 = vadd.f32 %v1367_v37, %v1345_v35  ;;  %v1346_v40 = vsel %vm1316_vm1, %v2213_v9, 0.0  ;;  %vm1331_vm4 = vcmp.eq.s32.totalorder %v2509_v6, %v2588_v8  ;;  %v1385_v39 = vadd.f32 %v1384_v41, %v1360_v60 }
 0x294   :  { %v2215_v15 = vpop.eup %2214  ;;  %v1409_v56 = vadd.f32 %v2213_v9, %v1408_v4  ;;  %vm1318_vm5 = vcmp.eq.s32.totalorder %v2535_v19, %v2529_v29  ;;  %v1361_v11 = vsel %vm1331_vm4, %v2555_v32, 0.0  ;;  %vm1332_vm6 = vcmp.eq.s32.totalorder %v2518_v20, %v2588_v8  ;;  %v1336_v4 = vld [vmem:[#allocation4] sm:$0xff] }
 0x295   :  { %v1369_v12 = vadd.f32 %v1368_v10, %v1346_v40  ;;  %v1347_v27 = vsel %vm1317_vm3, %v2215_v15, 0.0  ;;  %v1386_v47 = vadd.f32 %v1385_v39, %v1361_v11  ;;  %v1362_v6 = vsel %vm1332_vm6, %v2566_v21, 0.0 }
 0x296   :  { %v1410_v52 = vadd.f32 %v2215_v15, %v1409_v56  ;;  %v2217_v13 = vpop.eup %2216  ;;  %vm1319_vm7 = vcmp.eq.s32.totalorder %v2384_v38, %v2529_v29  ;;  %vm1333_vm8 = vcmp.eq.s32.totalorder %v2532_v17, %v2588_v8  ;;  %vm1334_vm9 = vcmp.eq.s32.totalorder %v2535_v19, %v2588_v8 }
 0x297   :  { %v1370_v2 = vadd.f32 %v1369_v12, %v1347_v27  ;;  %v1348_v45 = vsel %vm1318_vm5, %v2217_v13, 0.0  ;;  %v1387_v28 = vadd.f32 %v1386_v47, %v1362_v6  ;;  %v1363_v32 = vsel %vm1333_vm8, %v2572_v7, 0.0 }
 0x298   :  { %v1411_v5 = vadd.f32 %v2217_v13, %v1410_v52  ;;  %v2219_v51 = vpop.eup %2218  ;;  %v1364_v61 = vsel %vm1334_vm9, %v2579_v42, 0.0  ;;  %vm1335_vm10 = vcmp.eq.s32.totalorder %v2384_v38, %v2588_v8  ;;  %v1209_v17 = vmul.f32 1.442695, %v1205_v57  ;;  %v1402_v8 = vld [vmem:[#allocation3 + $0x10] sm:$0xff] }
 0x299   :  { %v1371_v24 = vadd.f32 %v1370_v2, %v1348_v45  ;;  %v1349_v1 = vsel %vm1319_vm7, %v2219_v51, 0.0  ;;  %v1388_v20 = vadd.f32 %v1387_v28, %v1363_v32  ;;  %v1365_v21 = vsel %vm1335_vm10, %v2586_v22, 0.0 }
 0x29a   :  { %v1412_v14 = vadd.f32 %v2219_v51, %v1411_v5  ;;  %2220 = vpow2.f32 %v1209_v17  ;;  %v1211_v19 = vmul.f32 1.442695, %v1206_v62  ;;  %v1338_v5 = vld [vmem:[#allocation4 + $0x10] sm:$0xff] }
 0x29b   :  { %v1372_v43 = vadd.f32 %v1371_v24, %v1349_v1  ;;  %v1389_v29 = vadd.f32 %v1388_v20, %v1364_v61 }
 0x29c   :  { %1413 = vadd.xlane.f32.xlu2 %v1412_v14  ;;  %2222 = vpow2.f32 %v1211_v19 }
 0x29d   :  { %v1390_v53 = vadd.f32 %v1389_v29, %v1365_v21 }
 0x2a0   :  { %v2221_v7 = vpop.eup %2220 }
 0x2a1   :  { %v1404_v42 = vmul.f32 %v2221_v7, %v1401_v25  ;;  %v1340_v55 = vmul.f32 %v2221_v7, %v1337_v0 }
 0x2a2   :  { %v2223_v22 = vpop.eup %2222 }
 0x2a3   :  { %v1405_v23 = vmul.f32 %v2223_v22, %v1402_v8  ;;  %v1341_v51 = vmul.f32 %v2223_v22, %v1338_v5 }
 0x2a4   :  { %1373 = vadd.xlane.f32.xlu2 %v1372_v43 }
 0x2ac   :  { %1391 = vadd.xlane.f32.xlu2 %v1390_v53 }
 0x2fa   :  { %v1423_v16 = vpop.xlane.xlu1 %1422 }
 0x2fb   :  { %v1434_v38 = vadd.f32 %v1423_v16, %v1404_v42 }
 0x2fd   :  { %1437 = vst.msk [vmem:[#allocation3 + $0x8] sm:$0xff] %vm34_vm0, %v1434_v38 }
 0x302   :  { %v1432_v54 = vpop.xlane.xlu0 %1431 }
 0x303   :  { %v1435_v57 = vadd.f32 %v1432_v54, %v1405_v23 }
 0x304   :  { %v1449_v59 = vld [vmem:[#allocation3 + $0x8] sm:$0xff]  ;;  %v1383_v62 = vpop.xlane.xlu1 %1382 }
 0x305   :  { %2224 = vrcp.f32 %v1449_v59  ;;  %1438 = vst.msk [vmem:[#allocation3 + $0x10] sm:$0xff] %vm34_vm0, %v1435_v57  ;;  %v1394_v30 = vadd.f32 %v1383_v62, %v1340_v55  ;;  %v1477_v48 = vand.u32 2147483648, %v1449_v59  ;;  %v1475_v46 = vand.u32 2147483647, %v1449_v59 }
 0x306   :  { %2226 = vpow2.f32 %v1207_v50  ;;  %vm1471_vm12 = vweird.f32 %v1449_v59 }
 0x307   :  { %1398 = vst.msk [vmem:[#allocation4 + $0x8] sm:$0xff] %vm34_vm0, %v1394_v30  ;;  %v1478_v37 = vor.u32 1.1754944e-38, %v1477_v48  ;;  %vm1476_vm14 = vcmp.eq.f32.partialorder %v1475_v46, 8.507059e+37 }
 0x30b   :  { %v2225_v58 = vpop.eup %2224 }
 0x30c   :  { %v2227_v26 = vpop.eup %2226  ;;  %v1467_v63 = vmul.f32 %v2225_v58, %v1449_v59  ;;  %v2674_v31 = vld [vmem:[#allocation3 + $0x10] sm:$0xff]  ;;  %vm1472_vm11 = vweird.f32 %v2225_v58 }
 0x30d   :  { %2228 = vrcp.f32 %v2674_v31  ;;  %v1403_v49 = vmul.f32 %v2227_v26, %v1400_v34  ;;  %vm1473_vm13 = vmor %vm1471_vm12, %vm1472_vm11  ;;  %v1339_v56 = vmul.f32 %v2227_v26, %v1336_v4  ;;  %vm1486_vm1 = vweird.f32 %v2674_v31 }
 0x30e   :  { %v1468_v44 = vsub.f32 1.0, %v1467_v63  ;;  %v1446_v10 = vld [vmem:[#allocation4 + $0x8] sm:$0xff]  ;;  %v1492_v1 = vand.u32 2147483648, %v2674_v31  ;;  %v1490_v61 = vand.u32 2147483647, %v2674_v31 }
 0x30f   :  { %v1414_v18 = vpop.xlane.xlu2 %1413 }
 0x310   :  { %v1469_v33 = vmul.f32 %v2225_v58, %v1468_v44  ;;  %v1433_v36 = vadd.f32 %v1414_v18, %v1403_v49  ;;  %v1493_v17 = vor.u32 1.1754944e-38, %v1492_v1  ;;  %vm1491_vm7 = vcmp.eq.f32.partialorder %v1490_v61, 8.507059e+37 }
 0x312   :  { %v1470_v3 = vadd.f32 %v2225_v58, %v1469_v33  ;;  %1436 = vst.msk [vmem:[#allocation3] sm:$0xff] %vm34_vm0, %v1433_v36 }
 0x313   :  { %v2229_v35 = vpop.eup %2228 }
 0x314   :  { %v1474_v9 = vsel %vm1473_vm13, %v2225_v58, %v1470_v3  ;;  %v1482_v40 = vmul.f32 %v2229_v35, %v2674_v31  ;;  %vm1487_vm15 = vweird.f32 %v2229_v35 }
 0x315   :  { %v1479_v41 = vsel %vm1476_vm14, %v1478_v37, %v1474_v9  ;;  %vm1488_vm3 = vmor %vm1486_vm1, %vm1487_vm15 }
 0x316   :  { %v1480_v15 = vmul.f32 %v1479_v41, %v1446_v10  ;;  %v1483_v13 = vsub.f32 1.0, %v1482_v40 }
 0x317   :  { %v1374_v52 = vpop.xlane.xlu2 %1373 }
 0x318   :  { %v1497_v60 = vadd.f32 1e-06, %v1480_v15  ;;  %v1393_v12 = vadd.f32 %v1374_v52, %v1339_v56  ;;  %v1484_v11 = vmul.f32 %v2229_v35, %v1483_v13 }
 0x319   :  { %v1448_v39 = vld [vmem:[#allocation3] sm:$0xff] }
 0x31a   :  { %2230 = vlog2.f32 %v1497_v60  ;;  %1397 = vst.msk [vmem:[#allocation4] sm:$0xff] %vm34_vm0, %v1393_v12  ;;  %v1485_v28 = vadd.f32 %v2229_v35, %v1484_v11  ;;  %v1462_v32 = vand.u32 2147483648, %v1448_v39  ;;  %v1460_v20 = vand.u32 2147483647, %v1448_v39 }
 0x31b   :  { %2232 = vrcp.f32 %v1448_v39  ;;  %vm1456_vm4 = vweird.f32 %v1448_v39 }
 0x31c   :  { %v1489_v21 = vsel %vm1488_vm3, %v2229_v35, %v1485_v28  ;;  %v1463_v53 = vor.u32 1.1754944e-38, %v1462_v32  ;;  %vm1461_vm6 = vcmp.eq.f32.partialorder %v1460_v20, 8.507059e+37 }
 0x31d   :  { %v1494_v42 = vsel %vm1491_vm7, %v1493_v17, %v1489_v21 }
 0x31f   :  { %v1392_v14 = vpop.xlane.xlu2 %1391 }
 0x320   :  { %v2231_v27 = vpop.eup %2230  ;;  %v1395_v45 = vadd.f32 %v1392_v14, %v1341_v51 }
 0x321   :  { %v2233_v2 = vpop.eup %2232  ;;  %v1502_v47 = vmul.f32 0.6931472, %v2231_v27  ;;  %v1445_v7 = vld [vmem:[#allocation4] sm:$0xff] }
 0x322   :  { %v1452_v6 = vmul.f32 %v2233_v2, %v1448_v39  ;;  %1399 = vst.msk [vmem:[#allocation4 + $0x10] sm:$0xff] %vm34_vm0, %v1395_v45  ;;  %vm1457_vm2 = vweird.f32 %v2233_v2 }
 0x323   :  { %1506 = vst.msk [vmem:[%s2699_s3 + $0x8] sm:$0xff] %vm34_vm0, %v1502_v47  ;;  %vm1458_vm5 = vmor %vm1456_vm4, %vm1457_vm2 }
 0x324   :  { %v1453_v24 = vsub.f32 1.0, %v1452_v6 }
 0x326   :  { %v1454_v43 = vmul.f32 %v2233_v2, %v1453_v24 }
 0x328   :  { %v1455_v29 = vadd.f32 %v2233_v2, %v1454_v43 }
 0x329   :  { %v1447_v16 = vld [vmem:[#allocation4 + $0x10] sm:$0xff] }
 0x32a   :  { %v1459_v19 = vsel %vm1458_vm5, %v2233_v2, %v1455_v29  ;;  %v1495_v22 = vmul.f32 %v1494_v42, %v1447_v16 }
 0x32b   :  { %v1464_v25 = vsel %vm1461_vm6, %v1463_v53, %v1459_v19 }
 0x32c   :  { %v1465_v38 = vmul.f32 %v1464_v25, %v1445_v7  ;;  %v1498_v23 = vadd.f32 1e-06, %v1495_v22 }
 0x32e   :  { %v1496_v8 = vadd.f32 1e-06, %v1465_v38 }
 0x330   :  { %2234 = vlog2.f32 %v1496_v8 }
 0x331   :  { %2236 = vlog2.f32 %v1498_v23 }
 0x336   :  { %v2235_v0 = vpop.eup %2234 }
 0x337   :  { %v2237_v50 = vpop.eup %2236  ;;  %v1500_v54 = vmul.f32 0.6931472, %v2235_v0 }
 0x338   :  { %v1504_v57 = vmul.f32 0.6931472, %v2237_v50 }
 0x339   :  { %1505 = vst.msk [vmem:[%s2699_s3] sm:$0xff] %vm34_vm0, %v1500_v54 }
 0x33a   :  { %1507 = vst.msk [vmem:[%s2699_s3 + $0x10] sm:$0xff] %vm34_vm0, %v1504_v57 }
 0x33b   :  { %1512 = vsyncpa [#allocation6], 1 }

</bundles_post_ra>
